<compile_context>
chip_gen: v5e
topology: v5e:2x2
jax: 0.10.0
libtpu: 0.0.40
codegen_flags: <defaults>
</compile_context>

<pallas_src>
import numpy as np

import jax
import jax.numpy as jnp
from jax.experimental import pallas as pl
from jax.experimental.pallas import tpu as pltpu


def _round_up(x, m):
    return ((x + m - 1) // m) * m


def _pick_block_b(B):
    # >=2 batch blocks whenever B allows it (so dimension_semantics=("parallel",...)
    # actually feeds v7x's second TensorCore) while bounding padding waste.
    # Cap at 512 rows: ample VMEM headroom on v5e/v6e (128 MiB) and v7x (64 MiB).
    half = _round_up(max((B + 1) // 2, 1), 8)
    return max(8, min(512, half))


def preprocess_lstm_weights(w_ih, b_ih, b_hh):
    """One-time preprocessing (cache the result; do NOT call per step).

    W_ih is transposed so the 4H gate dim is lane-dense for the MXU and cast to
    bf16 (single-pass MXU, f32 accumulation); the two biases are folded.  W_hh
    is dropped entirely: h is re-zeroed every forward(), so its contribution is
    exactly zero.
    """
    w_ihT_bf16 = jnp.asarray(w_ih, jnp.float32).T.astype(jnp.bfloat16)      # (I, 4H)
    bias = (jnp.asarray(b_ih, jnp.float32)
            + jnp.asarray(b_hh, jnp.float32)).reshape(1, -1)                # (1, 4H)
    return w_ihT_bf16, bias


# ======================================================================
# CatchCore: nn.LSTMCell(256, 256) forward, h reset to zeros each call
# ======================================================================

def _catch_core_kernel(g_ref, c_ref, w_ref, b_ref, h_out_ref, c_out_ref):
    H = h_out_ref.shape[-1]
    g = g_ref[...].astype(jnp.bfloat16)                      # bf16 MXU input
    gates = jnp.dot(g, w_ref[...],
                    preferred_element_type=jnp.float32)      # (Bt, 4H) lane-dense
    gates = gates + b_ref[...]                               # bias = b_ih + b_hh
    i_g = jax.nn.sigmoid(gates[:, 0 * H:1 * H])
    f_g = jax.nn.sigmoid(gates[:, 1 * H:2 * H])
    g_g = jnp.tanh(gates[:, 2 * H:3 * H])
    o_g = jax.nn.sigmoid(gates[:, 3 * H:4 * H])
    c_new = f_g * c_ref[...].astype(jnp.float32) + i_g * g_g
    h_out_ref[...] = (o_g * jnp.tanh(c_new)).astype(h_out_ref.dtype)
    c_out_ref[...] = c_new.astype(c_out_ref.dtype)


def catch_core_pallas(g, cell, w_ihT_bf16, bias, *, block_b=None,
                      out_dtype=jnp.float32, cell_dtype=jnp.float32):
    """One CatchCore forward step.  Takes PRE-PROCESSED weights.  Returns (h, c')."""
    B, I = g.shape
    Bc, H = cell.shape
    assert Bc == B and w_ihT_bf16.shape == (I, 4 * H) and bias.shape == (1, 4 * H)

    if block_b is None:
        block_b = _pick_block_b(B)
    B_pad = _round_up(B, block_b)
    if B_pad != B:
        g = jnp.pad(g, ((0, B_pad - B), (0, 0)))
        cell = jnp.pad(cell, ((0, B_pad - B), (0, 0)))
    nb = B_pad // block_b

    h_out, c_out = pl.pallas_call(
        _catch_core_kernel,
        out_shape=(jax.ShapeDtypeStruct((B_pad, H), out_dtype),
                   jax.ShapeDtypeStruct((B_pad, H), cell_dtype)),
        grid=(nb,),
        in_specs=[
            pl.BlockSpec((block_b, I), lambda b: (b, 0)),        # g
            pl.BlockSpec((block_b, H), lambda b: (b, 0)),        # cell
            pl.BlockSpec((I, 4 * H), lambda b: (0, 0)),          # W_ih^T bf16 (resident)
            pl.BlockSpec((1, 4 * H), lambda b: (0, 0)),          # folded bias (resident)
        ],
        out_specs=(pl.BlockSpec((block_b, H), lambda b: (b, 0)),
                   pl.BlockSpec((block_b, H), lambda b: (b, 0))),
        compiler_params=pltpu.CompilerParams(
            dimension_semantics=("parallel",)),                  # 2 TCs on v7x
    )(g, cell, w_ihT_bf16, bias)

    return h_out[:B], c_out[:B]


def _catch_core_seq_kernel(g_ref, c0_ref, w_ref, b_ref, h_out_ref, c_out_ref,
                           c_acc):
    t = pl.program_id(1)
    H = h_out_ref.shape[-1]

    @pl.when(t == 0)
    def _():
        c_acc[...] = c0_ref[...].astype(jnp.float32)

    g = g_ref[0].astype(jnp.bfloat16)                        # (Bt, I) bf16
    gates = jnp.dot(g, w_ref[...],
                    preferred_element_type=jnp.float32) + b_ref[...]
    i_g = jax.nn.sigmoid(gates[:, 0 * H:1 * H])
    f_g = jax.nn.sigmoid(gates[:, 1 * H:2 * H])
    g_g = jnp.tanh(gates[:, 2 * H:3 * H])
    o_g = jax.nn.sigmoid(gates[:, 3 * H:4 * H])
    c_new = f_g * c_acc[...] + i_g * g_g
    c_acc[...] = c_new
    h_out_ref[0] = (o_g * jnp.tanh(c_new)).astype(h_out_ref.dtype)

    @pl.when(t == pl.num_programs(1) - 1)
    def _():
        c_out_ref[...] = c_new.astype(c_out_ref.dtype)


def catch_core_seq_pallas(gs, cell0, w_ihT_bf16, bias, *, block_b=None,
                          out_dtype=jnp.float32, cell_dtype=jnp.float32):
    """Fused multi-timestep CatchCore: T forward() calls in ONE pallas_call.

    Semantics per step are identical to the spec module (h reset to zeros each
    step, cell carried).  The cell lives in a VMEM scratch across the T axis,
    so it never round-trips through HBM between steps; weights stay resident.
    """
    T, B, I = gs.shape
    Bc, H = cell0.shape
    assert Bc == B and w_ihT_bf16.shape == (I, 4 * H) and bias.shape == (1, 4 * H)

    if block_b is None:
        block_b = _pick_block_b(B)
    B_pad = _round_up(B, block_b)
    if B_pad != B:
        gs = jnp.pad(gs, ((0, 0), (0, B_pad - B), (0, 0)))
        cell0 = jnp.pad(cell0, ((0, B_pad - B), (0, 0)))
    nb = B_pad // block_b

    hs, c_out = pl.pallas_call(
        _catch_core_seq_kernel,
        out_shape=(jax.ShapeDtypeStruct((T, B_pad, H), out_dtype),
                   jax.ShapeDtypeStruct((B_pad, H), cell_dtype)),
        grid=(nb, T),
        in_specs=[
            pl.BlockSpec((1, block_b, I), lambda b, t: (t, b, 0)),   # glimpse at step t
            pl.BlockSpec((block_b, H), lambda b, t: (b, 0)),         # initial cell
            pl.BlockSpec((I, 4 * H), lambda b, t: (0, 0)),           # W_ih^T bf16 (resident)
            pl.BlockSpec((1, 4 * H), lambda b, t: (0, 0)),           # folded bias (resident)
        ],
        out_specs=(pl.BlockSpec((1, block_b, H), lambda b, t: (t, b, 0)),
                   pl.BlockSpec((block_b, H), lambda b, t: (b, 0))),
        scratch_shapes=[pltpu.VMEM((block_b, H), jnp.float32)],      # carried cell
        compiler_params=pltpu.CompilerParams(
            dimension_semantics=("parallel", "arbitrary")),
    )(gs, cell0, w_ihT_bf16, bias)

    return hs[:, :B], c_out[:B]


class CatchCore:
    """JAX/Pallas mirror of the PyTorch CatchCore module (LSTMCell, h reset each call)."""

    def __init__(self, key, input_size=256, hidden_size=256):
        self.input_size = input_size
        self.hidden_size = hidden_size
        k1, k2, k3, k4 = jax.random.split(key, 4)
        s = 1.0 / float(np.sqrt(hidden_size))          # PyTorch LSTMCell default init
        self.w_ih = jax.random.uniform(k1, (4 * hidden_size, input_size),
                                       jnp.float32, -s, s)
        self.w_hh = jax.random.uniform(k2, (4 * hidden_size, hidden_size),
                                       jnp.float32, -s, s)
        self.b_ih = jax.random.uniform(k3, (4 * hidden_size,), jnp.float32, -s, s)
        self.b_hh = jax.random.uniform(k4, (4 * hidden_size,), jnp.float32, -s, s)
        # Cached one-time preprocessing (review items #1/#2); w_hh is unused in
        # forward because h is re-zeroed every call.
        self.w_ihT_bf16, self.bias = preprocess_lstm_weights(
            self.w_ih, self.b_ih, self.b_hh)
        self.cell = None

    def initialize(self, B):
        self.cell = jnp.zeros((B, self.hidden_size), jnp.float32)

    def __call__(self, g):
        # TODO(synk): the persistent `self.cell` nn.Module attribute (and .to(device))
        # is host-side state; mirrored by this class carrying the kernel's new cell.
        h, self.cell = catch_core_pallas(g, self.cell, self.w_ihT_bf16, self.bias)
        return h

    def forward_sequence(self, gs):
        """Apply forward() to each of the T glimpses in gs (T, B, I) with ONE kernel."""
        hs, self.cell = catch_core_seq_pallas(gs, self.cell, self.w_ihT_bf16, self.bias)
        return hs


def catch_core_ref(g, cell, w_ih, w_hh, b_ih, b_hh):
    """Pure-JAX f32 reference of one CatchCore forward step (matches the PyTorch spec)."""
    h0 = jnp.zeros_like(cell)
    gates = (jnp.dot(g.astype(jnp.float32), w_ih.astype(jnp.float32).T,
                     precision=jax.lax.Precision.HIGHEST) + b_ih
             + jnp.dot(h0, w_hh.astype(jnp.float32).T,
                       precision=jax.lax.Precision.HIGHEST) + b_hh)
    i, f, gg, o = jnp.split(gates, 4, axis=-1)
    c_new = jax.nn.sigmoid(f) * cell + jax.nn.sigmoid(i) * jnp.tanh(gg)
    h_new = jax.nn.sigmoid(o) * jnp.tanh(c_new)
    return h_new, c_new


# ======================================================================
# CatchLoss (REINFORCE loss) — T-tiled reduction grid, pre-summed L axis
# ======================================================================

def _catch_loss_kernel(reward_ref, logpi_a_ref, logpi_lsum_ref, disc_ref,
                       params_ref, out_ref):
    t = pl.program_id(0)
    baseline = params_ref[0]          # packed SMEM f32[4]: [baseline, wa, wl, wb]
    wa = params_ref[1]
    wl = params_ref[2]
    wb = params_ref[3]

    reward = reward_ref[...].astype(jnp.float32)             # (1, B)   lanes = B
    r_b = reward - baseline                                  # (1, B)

    disc = disc_ref[...]                                     # (Tb, 1)  gamma^(T-1-t)
    la = logpi_a_ref[...].astype(jnp.float32)                # (Tb, B)
    ll = logpi_lsum_ref[...].astype(jnp.float32)             # (Tb, B)  L pre-summed

    weighted = disc * r_b                                    # (Tb, B), shared
    a_part = -jnp.sum(la * weighted)
    l_part = -jnp.sum(ll * weighted)

    @pl.when(t == 0)
    def _():
        out_ref[0] = a_part
        out_ref[1] = l_part
        out_ref[2] = jnp.sum((baseline - reward) ** 2)       # b_loss (T-independent)

    @pl.when(t > 0)
    def _():
        out_ref[0] = out_ref[0] + a_part
        out_ref[1] = out_ref[1] + l_part

    @pl.when(t == pl.num_programs(0) - 1)
    def _():
        a_loss = out_ref[0]
        l_loss = out_ref[1]
        b_loss = out_ref[2]
        out_ref[3] = (a_loss * jnp.exp(-wa) + wa
                      + l_loss * jnp.exp(-wl) + wl
                      + b_loss * jnp.exp(-wb) + wb)


def catch_loss_pallas(reward, logpi_a, logpi_l, baseline, wa, wl, wb, gamma,
                      *, block_t=None):
    """reward: (B,), logpi_a: (T, B), logpi_l: (T, B, L); scalar params; python gamma."""
    T, B = logpi_a.shape
    assert logpi_l.shape[:2] == (T, B)

    reward2d = jnp.asarray(reward, jnp.float32).reshape(1, B)     # batch on lanes
    # Pre-sum the small L axis in the wrapper in native dtype (XLA fuses this
    # into the producer); replaces the previous full (2,0,1) HBM relayout and
    # shrinks kernel input bytes by L x.
    logpi_lsum = logpi_l.sum(axis=-1)                             # (T, B)

    # Discount table gamma^(T-1-t), precomputed at trace time with numpy using the
    # same iterative f32 multiply as the reference's `r_b *= gamma` loop.
    disc_np = np.empty((T, 1), dtype=np.float32)
    p = np.float32(1.0)
    for t in range(T - 1, -1, -1):
        disc_np[t, 0] = p
        p = np.float32(p * np.float32(gamma))
    disc = jnp.asarray(disc_np)

    # All four scalar parameters packed into a single flat SMEM f32[4].
    params = jnp.stack([jnp.asarray(baseline, jnp.float32),
                        jnp.asarray(wa, jnp.float32),
                        jnp.asarray(wl, jnp.float32),
                        jnp.asarray(wb, jnp.float32)])

    # T-tiled reduction grid: losses accumulate in the resident SMEM output, so
    # long episodes never exceed v7x's 32 MiB scoped VMEM default.
    if block_t is None:
        block_t = min(512, _round_up(T, 8))
    T_pad = _round_up(T, block_t)
    if T_pad != T:
        pad = ((0, T_pad - T), (0, 0))
        logpi_a = jnp.pad(logpi_a, pad)          # zero rows contribute 0 to the sums
        logpi_lsum = jnp.pad(logpi_lsum, pad)
        disc = jnp.pad(disc, pad)
    nt = T_pad // block_t

    # TODO(synk): TensorBoard logging, the cross-call list accumulation of
    # logpi_{a,l}, and the `notinit` parameter-data mutation are host-side.
    # TODO(synk): with B=8 only 8/128 lanes are used; when many episodes are
    # available, stack them along the lane (B) axis and/or add a "parallel"
    # episode grid axis so both v7x TensorCores get work.
    out = pl.pallas_call(
        _catch_loss_kernel,
        out_shape=jax.ShapeDtypeStruct((4,), jnp.float32),
        grid=(nt,),
        in_specs=[
            pl.BlockSpec((1, B), lambda t: (0, 0)),              # reward (resident)
            pl.BlockSpec((block_t, B), lambda t: (t, 0)),        # logpi_a tile
            pl.BlockSpec((block_t, B), lambda t: (t, 0)),        # logpi_l (L pre-summed) tile
            pl.BlockSpec((block_t, 1), lambda t: (t, 0)),        # disc tile
            pl.BlockSpec(memory_space=pltpu.MemorySpace.SMEM),   # params (4,)
        ],
        out_specs=pl.BlockSpec(memory_space=pltpu.MemorySpace.SMEM),
        compiler_params=pltpu.CompilerParams(
            dimension_semantics=("arbitrary",)),                 # T is a reduction axis
    )(reward2d, logpi_a, logpi_lsum, disc, params)
    return out[0], out[1], out[2], out[3]


def catch_loss_ref(reward, logpi_a, logpi_l, baseline, wa, wl, wb, gamma):
    """Pure-JAX reference mirroring the PyTorch python loop."""
    r_b = reward - baseline
    a_loss = jnp.float32(0.0)
    l_loss = jnp.float32(0.0)
    T = logpi_a.shape[0]
    for t in reversed(range(T)):
        a_loss = a_loss + (-(logpi_a[t] * r_b).sum())
        l_loss = l_loss + (-(logpi_l[t].sum(-1) * r_b).sum())
        r_b = gamma * r_b
    b_loss = ((baseline - reward) ** 2).sum()
    combined = (a_loss * jnp.exp(-wa) + wa
                + l_loss * jnp.exp(-wl) + wl
                + b_loss * jnp.exp(-wb) + wb)
    return a_loss, l_loss, b_loss, combined


if __name__ == "__main__":
    key = jax.random.PRNGKey(0)
    k_core, k_g1, k_g2, k_gs, k_r, k_a, k_l = jax.random.split(key, 7)

    # ---- CatchCore (the spec module): LSTMCell(256, 256), batch B = 8 ----
    B = 8
    core = CatchCore(k_core)
    core.initialize(B)
    g1 = jax.random.normal(k_g1, (B, 256), jnp.float32)
    g2 = jax.random.normal(k_g2, (B, 256), jnp.float32)

    cell0 = core.cell
    h1 = core(g1)                    # first step: cell starts at zeros
    cell1 = core.cell
    h2 = core(g2)                    # second step: exercises the carried cell state
    cell2 = core.cell
    jax.block_until_ready(h2)

    h1_ref, c1_ref = catch_core_ref(g1, cell0, core.w_ih, core.w_hh,
                                    core.b_ih, core.b_hh)
    h2_ref, c2_ref = catch_core_ref(g2, c1_ref, core.w_ih, core.w_hh,
                                    core.b_ih, core.b_hh)

    # bf16 MXU inputs with f32 accumulation vs. the f32 HIGHEST reference.
    tol = dict(rtol=2e-2, atol=2e-2)
    assert jnp.allclose(h1, h1_ref, **tol)
    assert jnp.allclose(cell1, c1_ref, **tol)
    assert jnp.allclose(h2, h2_ref, **tol)
    assert jnp.allclose(cell2, c2_ref, **tol)

    # ---- Fused multi-timestep CatchCore (one pallas_call for T steps) ----
    T_seq = 4
    gs = jax.random.normal(k_gs, (T_seq, B, 256), jnp.float32)
    core_seq = CatchCore(k_core)     # same key -> identical weights
    core_seq.initialize(B)
    hs = core_seq.forward_sequence(gs)
    cell_seq = core_seq.cell
    jax.block_until_ready(hs)

    c_ref_t = jnp.zeros((B, 256), jnp.float32)
    hs_ref = []
    for t in range(T_seq):
        h_ref_t, c_ref_t = catch_core_ref(gs[t], c_ref_t, core_seq.w_ih,
                                          core_seq.w_hh, core_seq.b_ih,
                                          core_seq.b_hh)
        hs_ref.append(h_ref_t)
    hs_ref = jnp.stack(hs_ref)

    tol_seq = dict(rtol=3e-2, atol=3e-2)
    assert jnp.allclose(hs, hs_ref, **tol_seq)
    assert jnp.allclose(cell_seq, c_ref_t, **tol_seq)

    # ---- CatchLoss companion kernel ----
    T, L = 8, 2
    gamma = 0.9
    reward = (jax.random.uniform(k_r, (B,)) > 0.5).astype(jnp.float32)
    logpi_a = jnp.log(jax.random.uniform(k_a, (T, B), minval=0.05, maxval=1.0))
    logpi_l = jnp.log(jax.random.uniform(k_l, (T, B, L), minval=0.05, maxval=1.0))
    baseline = reward.mean()
    wa = jnp.float32(1.0)
    wl = jnp.float32(1.0)
    wb = jnp.float32(1.0)

    a_loss, l_loss, b_loss, combined = catch_loss_pallas(
        reward, logpi_a, logpi_l, baseline, wa, wl, wb, gamma)
    jax.block_until_ready(combined)

    a_ref, l_ref, b_ref, c_ref = catch_loss_ref(
        reward, logpi_a, logpi_l, baseline, wa, wl, wb, gamma)

    assert jnp.allclose(a_loss, a_ref, rtol=1e-5, atol=1e-5), (a_loss, a_ref)
    assert jnp.allclose(l_loss, l_ref, rtol=1e-5, atol=1e-5), (l_loss, l_ref)
    assert jnp.allclose(b_loss, b_ref, rtol=1e-5, atol=1e-5), (b_loss, b_ref)
    assert jnp.allclose(combined, c_ref, rtol=1e-5, atol=1e-5), (combined, c_ref)

    print("KERNEL_OK")
</pallas_src>

<mosaic_0001>
module attributes {stable_mosaic.version = 11 : i64} {
  func.func @_catch_core_kernel(%arg0: i32, %arg1: memref<8x256xf32, #tpu.memory_space<vmem>>, %arg2: memref<8x256xf32, #tpu.memory_space<vmem>>, %arg3: memref<256x1024xbf16, #tpu.memory_space<vmem>>, %arg4: memref<1x1024xf32, #tpu.memory_space<vmem>>, %arg5: memref<8x256xf32, #tpu.memory_space<vmem>>, %arg6: memref<8x256xf32, #tpu.memory_space<vmem>>) attributes {dimension_semantics = [#tpu.dimension_semantics<parallel>], iteration_bounds = array<i64: 1>, scalar_prefetch = 0 : i64, scratch_operands = 0 : i64, tpu.core_type = #tpu.core_type<tc>, window_params = [{transform_indices = @transform_0, window_bounds = array<i64: 8, 256>}, {transform_indices = @transform_1, window_bounds = array<i64: 8, 256>}, {pipeline_mode = #tpu.pipeline_mode<synchronous>, transform_indices = @transform_2, window_bounds = array<i64: 256, 1024>}, {pipeline_mode = #tpu.pipeline_mode<synchronous>, transform_indices = @transform_3, window_bounds = array<i64: 1, 1024>}, {transform_indices = @transform_4, window_bounds = array<i64: 8, 256>}, {transform_indices = @transform_5, window_bounds = array<i64: 8, 256>}]} {
    %c0 = arith.constant 0 : index
    %c0_0 = arith.constant 0 : index
    %0 = vector.load %arg1[%c0, %c0_0] : memref<8x256xf32, #tpu.memory_space<vmem>>, vector<8x256xf32>
    %1 = arith.truncf %0 : vector<8x256xf32> to vector<8x256xbf16>
    %c0_1 = arith.constant 0 : index
    %c0_2 = arith.constant 0 : index
    %2 = vector.load %arg3[%c0_1, %c0_2] : memref<256x1024xbf16, #tpu.memory_space<vmem>>, vector<256x1024xbf16>
    %cst = arith.constant dense<0.000000e+00> : vector<8x1024xf32>
    %3 = tpu.matmul %1, %2, %cst {dimension_numbers = #tpu.dot_dimension_numbers<[1], [0], [0], [1], [0, 0, 1, 1], [], []>} : vector<8x256xbf16>, vector<256x1024xbf16>, vector<8x1024xf32> -> vector<8x1024xf32>
    %c0_3 = arith.constant 0 : index
    %c0_4 = arith.constant 0 : index
    %4 = vector.load %arg4[%c0_3, %c0_4] : memref<1x1024xf32, #tpu.memory_space<vmem>>, vector<1x1024xf32>
    %5 = vector.broadcast %4 : vector<1x1024xf32> to vector<8x1024xf32>
    %6 = arith.addf %3, %5 : vector<8x1024xf32>
    %7 = vector.extract_strided_slice %6 {offsets = [0, 0], sizes = [8, 256], strides = [1, 1]} : vector<8x1024xf32> to vector<8x256xf32>
    %8 = arith.negf %7 : vector<8x256xf32>
    %9 = math.exp %8 : vector<8x256xf32>
    %cst_5 = arith.constant 1.000000e+00 : f32
    %10 = vector.broadcast %cst_5 : f32 to vector<8x256xf32>
    %11 = arith.addf %10, %9 : vector<8x256xf32>
    %12 = arith.divf %10, %11 : vector<8x256xf32>
    %13 = vector.extract_strided_slice %6 {offsets = [0, 256], sizes = [8, 256], strides = [1, 1]} : vector<8x1024xf32> to vector<8x256xf32>
    %14 = arith.negf %13 : vector<8x256xf32>
    %15 = math.exp %14 : vector<8x256xf32>
    %cst_6 = arith.constant 1.000000e+00 : f32
    %16 = vector.broadcast %cst_6 : f32 to vector<8x256xf32>
    %17 = arith.addf %16, %15 : vector<8x256xf32>
    %18 = arith.divf %16, %17 : vector<8x256xf32>
    %19 = vector.extract_strided_slice %6 {offsets = [0, 512], sizes = [8, 256], strides = [1, 1]} : vector<8x1024xf32> to vector<8x256xf32>
    %20 = math.tanh %19 : vector<8x256xf32>
    %21 = vector.extract_strided_slice %6 {offsets = [0, 768], sizes = [8, 256], strides = [1, 1]} : vector<8x1024xf32> to vector<8x256xf32>
    %22 = arith.negf %21 : vector<8x256xf32>
    %23 = math.exp %22 : vector<8x256xf32>
    %cst_7 = arith.constant 1.000000e+00 : f32
    %24 = vector.broadcast %cst_7 : f32 to vector<8x256xf32>
    %25 = arith.addf %24, %23 : vector<8x256xf32>
    %26 = arith.divf %24, %25 : vector<8x256xf32>
    %c0_8 = arith.constant 0 : index
    %c0_9 = arith.constant 0 : index
    %27 = vector.load %arg2[%c0_8, %c0_9] : memref<8x256xf32, #tpu.memory_space<vmem>>, vector<8x256xf32>
    %28 = arith.mulf %18, %27 : vector<8x256xf32>
    %29 = arith.mulf %12, %20 : vector<8x256xf32>
    %30 = arith.addf %28, %29 : vector<8x256xf32>
    %31 = math.tanh %30 : vector<8x256xf32>
    %32 = arith.mulf %26, %31 : vector<8x256xf32>
    %c0_10 = arith.constant 0 : index
    %c0_11 = arith.constant 0 : index
    %33 = vector.load %arg5[%c0_10, %c0_11] : memref<8x256xf32, #tpu.memory_space<vmem>>, vector<8x256xf32>
    tpu.vector_store %arg5[%c0_10, %c0_11], %32 {strides = array<i32>} : memref<8x256xf32, #tpu.memory_space<vmem>>, vector<8x256xf32>,
    %c0_12 = arith.constant 0 : index
    %c0_13 = arith.constant 0 : index
    %34 = vector.load %arg6[%c0_12, %c0_13] : memref<8x256xf32, #tpu.memory_space<vmem>>, vector<8x256xf32>
    tpu.vector_store %arg6[%c0_12, %c0_13], %30 {strides = array<i32>} : memref<8x256xf32, #tpu.memory_space<vmem>>, vector<8x256xf32>,
    return
  }
  func.func @transform_0(%arg0: i32) -> (i32, i32) {
    %c0_i32 = arith.constant 0 : i32
    %c0_i32_0 = arith.constant 0 : i32
    return %arg0, %c0_i32 : i32, i32
  }
  func.func @transform_1(%arg0: i32) -> (i32, i32) {
    %c0_i32 = arith.constant 0 : i32
    %c0_i32_0 = arith.constant 0 : i32
    return %arg0, %c0_i32 : i32, i32
  }
  func.func @transform_2(%arg0: i32) -> (i32, i32) {
    %c0_i32 = arith.constant 0 : i32
    %c0_i32_0 = arith.constant 0 : i32
    %c0_i32_1 = arith.constant 0 : i32
    return %c0_i32, %c0_i32_0 : i32, i32
  }
  func.func @transform_3(%arg0: i32) -> (i32, i32) {
    %c0_i32 = arith.constant 0 : i32
    %c0_i32_0 = arith.constant 0 : i32
    %c0_i32_1 = arith.constant 0 : i32
    return %c0_i32, %c0_i32_0 : i32, i32
  }
  func.func @transform_4(%arg0: i32) -> (i32, i32) {
    %c0_i32 = arith.constant 0 : i32
    %c0_i32_0 = arith.constant 0 : i32
    return %arg0, %c0_i32 : i32, i32
  }
  func.func @transform_5(%arg0: i32) -> (i32, i32) {
    %c0_i32 = arith.constant 0 : i32
    %c0_i32_0 = arith.constant 0 : i32
    return %arg0, %c0_i32 : i32, i32
  }
}

</mosaic_0001>

<bundles_post_ra>
// kernel: tpu_custom_call.1
= control target key start
LH: loop header
LB: loop body
LE: loop exit
PB: predicated region body
PF: predicated region fallthrough
CT: control target
= control target key end

     0   :  { %11 = vsyncpa [#allocation3], 0  ;;  %s2222_s0 = inlined_call_operand.hbm [shape: f32[8,256], index: 0, kind: input, shape index: {}]   ;;  %s2223_s1 = inlined_call_operand.hbm [shape: f32[8,256], index: 1, kind: input, shape index: {}]   ;;  %s2224_s2 = inlined_call_operand.hbm [shape: bf16[256,1024], index: 2, kind: input, shape index: {}]   ;;  %s2225_s3 = inlined_call_operand.hbm [shape: f32[1,1024], index: 3, kind: input, shape index: {}]   ;;  %s2226_s4 = inlined_call_operand.hbm [shape: f32[8,256], index: 4, kind: output, shape index: {0}]   ;;  %s2227_s5 = inlined_call_operand.hbm [shape: f32[8,256], index: 5, kind: output, shape index: {1}]  }
   0x1   :  { %12 = vsyncpa [#allocation6], 0 }
   0x2   :  { %13 = vsyncpa [#allocation9], 0 }
   0x3   :  { %14 = vsyncpa [#allocation4], 0  ;;  %s32_s20 = sshll.u32 %s2223_s1, 4  ;;  %s33_s20 = int_to_ptr.hbm [resolvable:$true] %s32_s20 }
   0x4   :  { %15 = vsyncpa [#allocation12], 0  ;;  %s2083_s21 = smov [#allocation5]   ;;  %s21_s25 = sshll.u32 %s2222_s0, 4  ;;  %s22_s25 = int_to_ptr.hbm [resolvable:$true] %s21_s25 }
   0x5   :  { %s34_s22 = sshll.u32 %s2083_s21, 4  ;;  %s2084_s26 = smov [#allocation2]   ;;  %s35_s22 = int_to_ptr.vmem [resolvable:$true] %s34_s22 }
   0x6   :  { %37 = dma.hbm_to_vmem [thread:$0]  %s33_s20, 256, %s35_s22, [#allocation6]  }
   0x7   :  { %s23_s27 = sshll.u32 %s2084_s26, 4  ;;  %s42_s30 = sshll.u32 %s2224_s2, 4  ;;  %s24_s27 = int_to_ptr.vmem [resolvable:$true] %s23_s27  ;;  %s43_s30 = int_to_ptr.hbm [resolvable:$true] %s42_s30 }
   0x8   :  { %26 = dma.hbm_to_vmem [thread:$0]  %s22_s25, 256, %s24_s27, [#allocation3]  }
   0x9   :  { %s2085_s1 = smov [#allocation7]   ;;  %s56_s9 = sshll.u32 %s2225_s3, 4  ;;  %s57_s9 = int_to_ptr.hbm [resolvable:$true] %s56_s9 }
   0xa   :  { %s44_s6 = sshll.u32 %s2085_s1, 4  ;;  %s2086_s10 = smov 512   ;;  %s45_s6 = int_to_ptr.vmem [resolvable:$true] %s44_s6 }
   0xb   :  { %s2087_s0 = smov 32   ;;  %s2088_s11 = smov [#allocation8]  }
   0xc   :  { %50 = dma.hbm_to_vmem [thread:$0]  %s43_s30, 16384, %s45_s6, [#allocation6], %s2086_s10, %s2086_s10, %s2087_s0  }
   0xd   :  { %s58_s12 = sshll.u32 %s2088_s11, 4  ;;  %s59_s12 = int_to_ptr.vmem [resolvable:$true] %s58_s12 }
   0xe   :  { %61 = dma.hbm_to_vmem [thread:$0]  %s57_s9, 128, %s59_s12, [#allocation9]  }
   0xf   :  { %2073 = dma.done.wait [#allocation3], 256  }
  0x10   :  { %2074 = vsyncadd [#allocation3], 4294967040 }
  0x11   :  { %2075 = dma.done.wait [#allocation6], 16640  }
  0x12   :  { %2076 = vsyncadd [#allocation6], 4294950656 }
  0x13   :  { %2077 = dma.done.wait [#allocation9], 128  }
  0x14   :  { %2078 = vsyncadd [#allocation9], 4294967168  ;;  %v1469_v0 = vld [vmem:[#allocation7 + $0x1c0] sm:$0xf]  ;;  %v1817_v5 = vld [vmem:[#allocation7 + $0x1c4] sm:$0xf] }
  0x15   :  { %v1821_v1 = vld [vmem:[#allocation7 + $0x1dc] sm:$0xf0]  ;;  %v1471_v6 = vld [vmem:[#allocation7 + $0x1e0] sm:$0xf0]  ;;  %s2089_s2 = smov [#allocation11]   ;;  %s1226_s15 = sshll.u32 %s2227_s5, 4  ;;  %s1227_s15 = int_to_ptr.hbm [resolvable:$true] %s1226_s15 }
  0x16   :  { %v1725_v2 = vld [vmem:[#allocation7 + $0x3c0] sm:$0xf]  ;;  %v1470_v3 = vor.u32 %v1821_v1, %v1469_v0  ;;  %v1474_v8 = vor.u32 %v1817_v5, %v1471_v6  ;;  %v1881_v9 = vld [vmem:[#allocation7 + $0x3c4] sm:$0xf]  ;;  %s1224_s3 = sshll.u32 %s2089_s2, 4  ;;  %s2090_s5 = smov [#allocation10]   ;;  %s1225_s3 = int_to_ptr.vmem [resolvable:$true] %s1224_s3 }
  0x17   :  { %v1885_v4 = vld [vmem:[#allocation7 + $0x3dc] sm:$0xf0]  ;;  %v1727_v10 = vld [vmem:[#allocation7 + $0x3e0] sm:$0xf0]  ;;  %s1213_s16 = sshll.u32 %s2090_s5, 4  ;;  %s1215_s19 = sshll.u32 %s2226_s4, 4  ;;  %s1214_s16 = int_to_ptr.vmem [resolvable:$true] %s1213_s16  ;;  %s1216_s19 = int_to_ptr.hbm [resolvable:$true] %s1215_s19 }
  0x18   :  { %v1726_v7 = vor.u32 %v1885_v4, %v1725_v2  ;;  %v1437_v11 = vld [vmem:[#allocation7 + $0x180] sm:$0xf]  ;;  %868 = vmatpush.bf16.msra.mxu0 %v1470_v3  ;;  %v1730_v12 = vor.u32 %v1881_v9, %v1727_v10  ;;  %894 = vmatpush.bf16.msra.mxu2 %v1474_v8  ;;  %v1809_v18 = vld [vmem:[#allocation7 + $0x184] sm:$0xf] }
  0x19   :  { %v1813_v13 = vld [vmem:[#allocation7 + $0x19c] sm:$0xf0]  ;;  %v1439_v19 = vld [vmem:[#allocation7 + $0x1a0] sm:$0xf0] }
  0x1a   :  { %v1693_v14 = vld [vmem:[#allocation7 + $0x380] sm:$0xf]  ;;  %881 = vmatpush.bf16.msra.mxu1 %v1726_v7  ;;  %v1438_v16 = vor.u32 %v1813_v13, %v1437_v11  ;;  %v1873_v20 = vld [vmem:[#allocation7 + $0x384] sm:$0xf]  ;;  %907 = vmatpush.bf16.msra.mxu3 %v1730_v12  ;;  %v1442_v21 = vor.u32 %v1809_v18, %v1439_v19 }
  0x1b   :  { %v1877_v15 = vld [vmem:[#allocation7 + $0x39c] sm:$0xf0]  ;;  %v1695_v22 = vld [vmem:[#allocation7 + $0x3a0] sm:$0xf0] }
  0x1c   :  { %v1694_v17 = vor.u32 %v1877_v15, %v1693_v14  ;;  %v1405_v23 = vld [vmem:[#allocation7 + $0x140] sm:$0xf]  ;;  %v1698_v25 = vor.u32 %v1873_v20, %v1695_v22  ;;  %v1801_v28 = vld [vmem:[#allocation7 + $0x144] sm:$0xf]  ;;  %869 = vmatpush.bf16.msra.mxu0 %v1438_v16  ;;  %895 = vmatpush.bf16.msra.mxu2 %v1442_v21 }
  0x1d   :  { %v1805_v24 = vld [vmem:[#allocation7 + $0x15c] sm:$0xf0]  ;;  %v1407_v30 = vld [vmem:[#allocation7 + $0x160] sm:$0xf0] }
  0x1e   :  { %v1661_v26 = vld [vmem:[#allocation7 + $0x340] sm:$0xf]  ;;  %v1406_v29 = vor.u32 %v1805_v24, %v1405_v23  ;;  %v1865_v31 = vld [vmem:[#allocation7 + $0x344] sm:$0xf]  ;;  %882 = vmatpush.bf16.msra.mxu1 %v1694_v17  ;;  %v1410_v34 = vor.u32 %v1801_v28, %v1407_v30  ;;  %908 = vmatpush.bf16.msra.mxu3 %v1698_v25  ;;  %v1477_v28 = vld [vmem:[#allocation7 + $0x1c8] sm:$0xf] }
  0x1f   :  { %v1869_v27 = vld [vmem:[#allocation7 + $0x35c] sm:$0xf0]  ;;  %v1663_v32 = vld [vmem:[#allocation7 + $0x360] sm:$0xf0]  ;;  %v1733_v30 = vld [vmem:[#allocation7 + $0x3c8] sm:$0xf] }
  0x20   :  { %v1662_v33 = vor.u32 %v1869_v27, %v1661_v26  ;;  %v1373_v35 = vld [vmem:[#allocation7 + $0x100] sm:$0xf]  ;;  %v1666_v38 = vor.u32 %v1865_v31, %v1663_v32  ;;  %v1793_v40 = vld [vmem:[#allocation7 + $0x104] sm:$0xf]  ;;  %870 = vmatpush.bf16.msra.mxu0 %v1406_v29  ;;  %896 = vmatpush.bf16.msra.mxu2 %v1410_v34  ;;  %v1822_v29 = vld [vmem:[#allocation7 + $0x1e4] sm:$0xf0] }
  0x21   :  { %v1797_v36 = vld [vmem:[#allocation7 + $0x11c] sm:$0xf0]  ;;  %v1375_v41 = vld [vmem:[#allocation7 + $0x120] sm:$0xf0]  ;;  %v1886_v32 = vld [vmem:[#allocation7 + $0x3e4] sm:$0xf0] }
  0x22   :  { %v1629_v37 = vld [vmem:[#allocation7 + $0x300] sm:$0xf]  ;;  %v1857_v42 = vld [vmem:[#allocation7 + $0x304] sm:$0xf]  ;;  %v1374_v44 = vor.u32 %v1797_v36, %v1373_v35  ;;  %883 = vmatpush.bf16.msra.mxu1 %v1662_v33  ;;  %v1378_v46 = vor.u32 %v1793_v40, %v1375_v41  ;;  %909 = vmatpush.bf16.msra.mxu3 %v1666_v38  ;;  %v1818_v33 = vld [vmem:[#allocation7 + $0x1cc] sm:$0xf]  ;;  %v1478_v40 = vor.u32 %v1822_v29, %v1477_v28 }
  0x23   :  { %v1861_v39 = vld [vmem:[#allocation7 + $0x31c] sm:$0xf0]  ;;  %v1631_v43 = vld [vmem:[#allocation7 + $0x320] sm:$0xf0]  ;;  %v1479_v34 = vld [vmem:[#allocation7 + $0x1e8] sm:$0xf0]  ;;  %v1734_v41 = vor.u32 %v1886_v32, %v1733_v30 }
  0x24   :  { %v1630_v45 = vor.u32 %v1861_v39, %v1629_v37  ;;  %v1341_v47 = vld [vmem:[#allocation7 + $0xc0] sm:$0xf]  ;;  %v1634_v50 = vor.u32 %v1857_v42, %v1631_v43  ;;  %v1785_v52 = vld [vmem:[#allocation7 + $0xc4] sm:$0xf]  ;;  %871 = vmatpush.bf16.msra.mxu0 %v1374_v44  ;;  %897 = vmatpush.bf16.msra.mxu2 %v1378_v46  ;;  %v1882_v37 = vld [vmem:[#allocation7 + $0x3cc] sm:$0xf]  ;;  %v1482_v42 = vor.u32 %v1818_v33, %v1479_v34 }
  0x25   :  { %v1789_v48 = vld [vmem:[#allocation7 + $0xdc] sm:$0xf0]  ;;  %v1343_v53 = vld [vmem:[#allocation7 + $0xe0] sm:$0xf0]  ;;  %v1735_v38 = vld [vmem:[#allocation7 + $0x3e8] sm:$0xf0] }
  0x26   :  { %v1597_v49 = vld [vmem:[#allocation7 + $0x2c0] sm:$0xf]  ;;  %v1849_v54 = vld [vmem:[#allocation7 + $0x2c4] sm:$0xf]  ;;  %v1342_v56 = vor.u32 %v1789_v48, %v1341_v47  ;;  %884 = vmatpush.bf16.msra.mxu1 %v1630_v45  ;;  %v1346_v58 = vor.u32 %v1785_v52, %v1343_v53  ;;  %910 = vmatpush.bf16.msra.mxu3 %v1634_v50  ;;  %v1445_v43 = vld [vmem:[#allocation7 + $0x188] sm:$0xf]  ;;  %v1738_v46 = vor.u32 %v1882_v37, %v1735_v38 }
  0x27   :  { %v1853_v51 = vld [vmem:[#allocation7 + $0x2dc] sm:$0xf0]  ;;  %v1599_v55 = vld [vmem:[#allocation7 + $0x2e0] sm:$0xf0]  ;;  %v1814_v44 = vld [vmem:[#allocation7 + $0x1a4] sm:$0xf0] }
  0x28   :  { %v1598_v57 = vor.u32 %v1853_v51, %v1597_v49  ;;  %v1309_v59 = vld [vmem:[#allocation7 + $0x80] sm:$0xf]  ;;  %v1602_v62 = vor.u32 %v1849_v54, %v1599_v55  ;;  %v1777_v0 = vld [vmem:[#allocation7 + $0x84] sm:$0xf]  ;;  %872 = vmatpush.bf16.msra.mxu0 %v1342_v56  ;;  %898 = vmatpush.bf16.msra.mxu2 %v1346_v58  ;;  %v1701_v45 = vld [vmem:[#allocation7 + $0x388] sm:$0xf]  ;;  %v1446_v53 = vor.u32 %v1814_v44, %v1445_v43 }
  0x29   :  { %v1781_v60 = vld [vmem:[#allocation7 + $0x9c] sm:$0xf0]  ;;  %v1311_v1 = vld [vmem:[#allocation7 + $0xa0] sm:$0xf0]  ;;  %v1878_v47 = vld [vmem:[#allocation7 + $0x3a4] sm:$0xf0] }
  0x2a   :  { %v1565_v61 = vld [vmem:[#allocation7 + $0x280] sm:$0xf]  ;;  %v1841_v2 = vld [vmem:[#allocation7 + $0x284] sm:$0xf]  ;;  %v1310_v4 = vor.u32 %v1781_v60, %v1309_v59  ;;  %885 = vmatpush.bf16.msra.mxu1 %v1598_v57  ;;  %v1314_v6 = vor.u32 %v1777_v0, %v1311_v1  ;;  %911 = vmatpush.bf16.msra.mxu3 %v1602_v62  ;;  %v1810_v48 = vld [vmem:[#allocation7 + $0x18c] sm:$0xf]  ;;  %v1702_v56 = vor.u32 %v1878_v47, %v1701_v45 }
  0x2b   :  { %v1845_v63 = vld [vmem:[#allocation7 + $0x29c] sm:$0xf0]  ;;  %v1567_v3 = vld [vmem:[#allocation7 + $0x2a0] sm:$0xf0]  ;;  %v1447_v49 = vld [vmem:[#allocation7 + $0x1a8] sm:$0xf0] }
  0x2c   :  { %v1566_v5 = vor.u32 %v1845_v63, %v1565_v61  ;;  %v1277_v7 = vld [vmem:[#allocation7 + $0x40] sm:$0xf]  ;;  %v1570_v10 = vor.u32 %v1841_v2, %v1567_v3  ;;  %v1769_v12 = vld [vmem:[#allocation7 + $0x44] sm:$0xf]  ;;  %873 = vmatpush.bf16.msra.mxu0 %v1310_v4  ;;  %899 = vmatpush.bf16.msra.mxu2 %v1314_v6  ;;  %v1874_v50 = vld [vmem:[#allocation7 + $0x38c] sm:$0xf]  ;;  %v1450_v57 = vor.u32 %v1810_v48, %v1447_v49 }
  0x2d   :  { %v1773_v8 = vld [vmem:[#allocation7 + $0x5c] sm:$0xf0]  ;;  %v1279_v13 = vld [vmem:[#allocation7 + $0x60] sm:$0xf0]  ;;  %v1703_v51 = vld [vmem:[#allocation7 + $0x3a8] sm:$0xf0] }
  0x2e   :  { %v1533_v9 = vld [vmem:[#allocation7 + $0x240] sm:$0xf]  ;;  %v1833_v14 = vld [vmem:[#allocation7 + $0x244] sm:$0xf]  ;;  %v1278_v16 = vor.u32 %v1773_v8, %v1277_v7  ;;  %886 = vmatpush.bf16.msra.mxu1 %v1566_v5  ;;  %v1282_v20 = vor.u32 %v1769_v12, %v1279_v13  ;;  %912 = vmatpush.bf16.msra.mxu3 %v1570_v10  ;;  %v1413_v54 = vld [vmem:[#allocation7 + $0x148] sm:$0xf]  ;;  %v1706_v61 = vor.u32 %v1874_v50, %v1703_v51 }
  0x2f   :  { %v1837_v11 = vld [vmem:[#allocation7 + $0x25c] sm:$0xf0]  ;;  %v1535_v15 = vld [vmem:[#allocation7 + $0x260] sm:$0xf0]  ;;  %v1806_v58 = vld [vmem:[#allocation7 + $0x164] sm:$0xf0] }
  0x30   :  { %v1245_v17 = vld [vmem:[#allocation7] sm:$0xf]  ;;  %v1534_v19 = vor.u32 %v1837_v11, %v1533_v9  ;;  %v1761_v23 = vld [vmem:[#allocation7 + $0x4] sm:$0xf]  ;;  %v1538_v24 = vor.u32 %v1833_v14, %v1535_v15  ;;  %874 = vmatpush.bf16.msra.mxu0 %v1278_v16  ;;  %900 = vmatpush.bf16.msra.mxu2 %v1282_v20  ;;  %v1669_v59 = vld [vmem:[#allocation7 + $0x348] sm:$0xf]  ;;  %v1414_v4 = vor.u32 %v1806_v58, %v1413_v54 }
  0x31   :  { %v1765_v18 = vld [vmem:[#allocation7 + $0x1c] sm:$0xf0]  ;;  %v1247_v25 = vld [vmem:[#allocation7 + $0x20] sm:$0xf0]  ;;  %v1870_v60 = vld [vmem:[#allocation7 + $0x364] sm:$0xf0] }
  0x32   :  { %v1501_v21 = vld [vmem:[#allocation7 + $0x200] sm:$0xf]  ;;  %v1825_v26 = vld [vmem:[#allocation7 + $0x204] sm:$0xf]  ;;  %v1246_v31 = vor.u32 %v1765_v18, %v1245_v17  ;;  %887 = vmatpush.bf16.msra.mxu1 %v1534_v19  ;;  %v1250_v36 = vor.u32 %v1761_v23, %v1247_v25  ;;  %913 = vmatpush.bf16.msra.mxu3 %v1538_v24  ;;  %v1802_v62 = vld [vmem:[#allocation7 + $0x14c] sm:$0xf]  ;;  %v1670_v5 = vor.u32 %v1870_v60, %v1669_v59 }
  0x33   :  { %v1829_v22 = vld [vmem:[#allocation7 + $0x21c] sm:$0xf0]  ;;  %v1503_v27 = vld [vmem:[#allocation7 + $0x220] sm:$0xf0]  ;;  %v1415_v63 = vld [vmem:[#allocation7 + $0x168] sm:$0xf0] }
  0x34   :  { %v1502_v35 = vor.u32 %v1829_v22, %v1501_v21  ;;  %v1506_v39 = vor.u32 %v1825_v26, %v1503_v27  ;;  %875 = vmatpush.bf16.msra.mxu0 %v1246_v31  ;;  %901 = vmatpush.bf16.msra.mxu2 %v1250_v36  ;;  %v78_v52 = vld [vmem:[#allocation2] sm:$0xff]  ;;  %v79_v0 = vld [vmem:[#allocation2 + $0x8] sm:$0xff]  ;;  %v1418_v6 = vor.u32 %v1802_v62, %v1415_v63 }
  0x35   :  { %v2133_v55 = vpack.c.bf16 %v78_v52, %v78_v52  ;;  %v1866_v1 = vld [vmem:[#allocation7 + $0x34c] sm:$0xf]  ;;  %v2136_v3 = vpack.c.bf16 %v79_v0, %v79_v0  ;;  %v1381_v7 = vld [vmem:[#allocation7 + $0x108] sm:$0xf] }
  0x36   :  { %888 = vmatpush.bf16.msra.mxu1 %v1502_v35  ;;  %914 = vmatpush.bf16.msra.mxu3 %v1506_v39  ;;  %v1671_v2 = vld [vmem:[#allocation7 + $0x368] sm:$0xf0]  ;;  %v1798_v8 = vld [vmem:[#allocation7 + $0x124] sm:$0xf0] }
  0x37   :  { %902 = vmatmul.bf16.vlgmr.msra.gmra.mxu2 %v2133_v55  ;;  %876 = vmatmul.bf16.vlgmr.msra.gmra.mxu0 %v2133_v55  ;;  %v1637_v9 = vld [vmem:[#allocation7 + $0x308] sm:$0xf]  ;;  %v1674_v10 = vor.u32 %v1866_v1, %v1671_v2  ;;  %v1794_v12 = vld [vmem:[#allocation7 + $0x10c] sm:$0xf]  ;;  %v1382_v16 = vor.u32 %v1798_v8, %v1381_v7  ;;  %v1485_v1 = vld [vmem:[#allocation7 + $0x1d0] sm:$0xf] }
  0x38   :  { %920 = vmatpush.bf16.msrb.mxu0 %v1478_v40  ;;  %946 = vmatpush.bf16.msrb.mxu2 %v1482_v42  ;;  %v1862_v11 = vld [vmem:[#allocation7 + $0x324] sm:$0xf0]  ;;  %v1383_v13 = vld [vmem:[#allocation7 + $0x128] sm:$0xf0]  ;;  %v1823_v2 = vld [vmem:[#allocation7 + $0x1ec] sm:$0xf0] }
  0x39   :  { %889 = vmatmul.bf16.vlgmr.msra.gmra.mxu1 %v2136_v3  ;;  %v1858_v14 = vld [vmem:[#allocation7 + $0x30c] sm:$0xf]  ;;  %915 = vmatmul.bf16.vlgmr.msra.gmra.mxu3 %v2136_v3  ;;  %v1638_v17 = vor.u32 %v1862_v11, %v1637_v9  ;;  %v1386_v18 = vor.u32 %v1794_v12, %v1383_v13  ;;  %v1349_v19 = vld [vmem:[#allocation7 + $0xc8] sm:$0xf]  ;;  %v1819_v7 = vld [vmem:[#allocation7 + $0x1d4] sm:$0xf] }
  0x3a   :  { %933 = vmatpush.bf16.msrb.mxu1 %v1734_v41  ;;  %959 = vmatpush.bf16.msrb.mxu3 %v1738_v46  ;;  %v1639_v15 = vld [vmem:[#allocation7 + $0x328] sm:$0xf0]  ;;  %v1790_v20 = vld [vmem:[#allocation7 + $0xe4] sm:$0xf0]  ;;  %v1487_v8 = vld [vmem:[#allocation7 + $0x1f0] sm:$0xf0] }
  0x3b   :  { %v1605_v21 = vld [vmem:[#allocation7 + $0x2c8] sm:$0xf]  ;;  %v1642_v22 = vor.u32 %v1858_v14, %v1639_v15  ;;  %v1786_v24 = vld [vmem:[#allocation7 + $0xcc] sm:$0xf]  ;;  %v1350_v28 = vor.u32 %v1790_v20, %v1349_v19  ;;  %v1883_v11 = vld [vmem:[#allocation7 + $0x3d4] sm:$0xf]  ;;  %v1486_v14 = vor.u32 %v1823_v2, %v1485_v1 }
  0x3c   :  { %921 = vmatpush.bf16.msrb.mxu0 %v1446_v53  ;;  %947 = vmatpush.bf16.msrb.mxu2 %v1450_v57  ;;  %v1854_v23 = vld [vmem:[#allocation7 + $0x2e4] sm:$0xf0]  ;;  %v1351_v25 = vld [vmem:[#allocation7 + $0xe8] sm:$0xf0]  ;;  %v1743_v12 = vld [vmem:[#allocation7 + $0x3f0] sm:$0xf0] }
  0x3d   :  { %v1850_v26 = vld [vmem:[#allocation7 + $0x2cc] sm:$0xf]  ;;  %v1606_v29 = vor.u32 %v1854_v23, %v1605_v21  ;;  %v1354_v30 = vor.u32 %v1786_v24, %v1351_v25  ;;  %v1317_v31 = vld [vmem:[#allocation7 + $0x88] sm:$0xf]  ;;  %v1709_v19 = vld [vmem:[#allocation7 + $0x390] sm:$0xf]  ;;  %v1746_v20 = vor.u32 %v1883_v11, %v1743_v12 }
  0x3e   :  { %934 = vmatpush.bf16.msrb.mxu1 %v1702_v56  ;;  %960 = vmatpush.bf16.msrb.mxu3 %v1706_v61  ;;  %v1607_v27 = vld [vmem:[#allocation7 + $0x2e8] sm:$0xf0]  ;;  %v1782_v32 = vld [vmem:[#allocation7 + $0xa4] sm:$0xf0]  ;;  %v1879_v21 = vld [vmem:[#allocation7 + $0x3ac] sm:$0xf0] }
  0x3f   :  { %v1573_v33 = vld [vmem:[#allocation7 + $0x288] sm:$0xf]  ;;  %v1610_v34 = vor.u32 %v1850_v26, %v1607_v27  ;;  %v1778_v36 = vld [vmem:[#allocation7 + $0x8c] sm:$0xf]  ;;  %v1318_v40 = vor.u32 %v1782_v32, %v1317_v31  ;;  %v1455_v23 = vld [vmem:[#allocation7 + $0x1b0] sm:$0xf0]  ;;  %v1710_v27 = vor.u32 %v1879_v21, %v1709_v19 }
  0x40   :  { %922 = vmatpush.bf16.msrb.mxu0 %v1414_v4  ;;  %948 = vmatpush.bf16.msrb.mxu2 %v1418_v6  ;;  %v1846_v35 = vld [vmem:[#allocation7 + $0x2a4] sm:$0xf0]  ;;  %v1319_v37 = vld [vmem:[#allocation7 + $0xa8] sm:$0xf0]  ;;  %v1741_v4 = vld [vmem:[#allocation7 + $0x3d0] sm:$0xf] }
  0x41   :  { %v1842_v38 = vld [vmem:[#allocation7 + $0x28c] sm:$0xf]  ;;  %v1574_v41 = vor.u32 %v1846_v35, %v1573_v33  ;;  %v1322_v42 = vor.u32 %v1778_v36, %v1319_v37  ;;  %v1285_v43 = vld [vmem:[#allocation7 + $0x48] sm:$0xf]  ;;  %v1887_v6 = vld [vmem:[#allocation7 + $0x3ec] sm:$0xf0] }
  0x42   :  { %935 = vmatpush.bf16.msrb.mxu1 %v1670_v5  ;;  %961 = vmatpush.bf16.msrb.mxu3 %v1674_v10  ;;  %v1575_v39 = vld [vmem:[#allocation7 + $0x2a8] sm:$0xf0]  ;;  %v1774_v44 = vld [vmem:[#allocation7 + $0x64] sm:$0xf0]  ;;  %v1742_v15 = vor.u32 %v1887_v6, %v1741_v4  ;;  %v1875_v24 = vld [vmem:[#allocation7 + $0x394] sm:$0xf] }
  0x43   :  { %v1541_v45 = vld [vmem:[#allocation7 + $0x248] sm:$0xf]  ;;  %v1578_v46 = vor.u32 %v1842_v38, %v1575_v39  ;;  %v1770_v48 = vld [vmem:[#allocation7 + $0x4c] sm:$0xf]  ;;  %v1286_v52 = vor.u32 %v1774_v44, %v1285_v43  ;;  %v1711_v25 = vld [vmem:[#allocation7 + $0x3b0] sm:$0xf0] }
  0x44   :  { %923 = vmatpush.bf16.msrb.mxu0 %v1382_v16  ;;  %949 = vmatpush.bf16.msrb.mxu2 %v1386_v18  ;;  %v1838_v47 = vld [vmem:[#allocation7 + $0x264] sm:$0xf0]  ;;  %v1287_v49 = vld [vmem:[#allocation7 + $0x68] sm:$0xf0]  ;;  %v1490_v16 = vor.u32 %v1819_v7, %v1487_v8  ;;  %v1815_v18 = vld [vmem:[#allocation7 + $0x1ac] sm:$0xf0]  ;;  %v1714_v32 = vor.u32 %v1875_v24, %v1711_v25 }
  0x45   :  { %v1834_v50 = vld [vmem:[#allocation7 + $0x24c] sm:$0xf]  ;;  %v1253_v53 = vld [vmem:[#allocation7 + $0x8] sm:$0xf]  ;;  %v1542_v56 = vor.u32 %v1838_v47, %v1541_v45  ;;  %v1290_v57 = vor.u32 %v1770_v48, %v1287_v49  ;;  %v1677_v31 = vld [vmem:[#allocation7 + $0x350] sm:$0xf] }
  0x46   :  { %936 = vmatpush.bf16.msrb.mxu1 %v1638_v17  ;;  %962 = vmatpush.bf16.msrb.mxu3 %v1642_v22  ;;  %v1543_v51 = vld [vmem:[#allocation7 + $0x268] sm:$0xf0]  ;;  %v1766_v54 = vld [vmem:[#allocation7 + $0x24] sm:$0xf0]  ;;  %v1453_v17 = vld [vmem:[#allocation7 + $0x190] sm:$0xf] }
  0x47   :  { %v1509_v58 = vld [vmem:[#allocation7 + $0x208] sm:$0xf]  ;;  %v1762_v60 = vld [vmem:[#allocation7 + $0xc] sm:$0xf]  ;;  %v1546_v61 = vor.u32 %v1834_v50, %v1543_v51  ;;  %v1254_v5 = vor.u32 %v1766_v54, %v1253_v53  ;;  %v1811_v22 = vld [vmem:[#allocation7 + $0x194] sm:$0xf]  ;;  %v1454_v26 = vor.u32 %v1815_v18, %v1453_v17 }
  0x48   :  { %924 = vmatpush.bf16.msrb.mxu0 %v1350_v28  ;;  %950 = vmatpush.bf16.msrb.mxu2 %v1354_v30  ;;  %v1830_v59 = vld [vmem:[#allocation7 + $0x224] sm:$0xf0]  ;;  %v1255_v62 = vld [vmem:[#allocation7 + $0x28] sm:$0xf0]  ;;  %v1458_v28 = vor.u32 %v1811_v22, %v1455_v23  ;;  %v1807_v30 = vld [vmem:[#allocation7 + $0x16c] sm:$0xf0] }
  0x49   :  { %v1826_v63 = vld [vmem:[#allocation7 + $0x20c] sm:$0xf]  ;;  %v1510_v9 = vor.u32 %v1830_v59, %v1509_v58  ;;  %v1258_v10 = vor.u32 %v1762_v60, %v1255_v62  ;;  %v1871_v33 = vld [vmem:[#allocation7 + $0x36c] sm:$0xf0]  ;;  %v1423_v35 = vld [vmem:[#allocation7 + $0x170] sm:$0xf0] }
  0x4a   :  { %937 = vmatpush.bf16.msrb.mxu1 %v1606_v29  ;;  %963 = vmatpush.bf16.msrb.mxu3 %v1610_v34  ;;  %v1511_v0 = vld [vmem:[#allocation7 + $0x228] sm:$0xf0]  ;;  %v1421_v29 = vld [vmem:[#allocation7 + $0x150] sm:$0xf]  ;;  %v1803_v34 = vld [vmem:[#allocation7 + $0x154] sm:$0xf]  ;;  %v1678_v39 = vor.u32 %v1871_v33, %v1677_v31 }
  0x4b   :  { %v1514_v13 = vor.u32 %v1826_v63, %v1511_v0  ;;  %v1867_v36 = vld [vmem:[#allocation7 + $0x354] sm:$0xf]  ;;  %v1422_v38 = vor.u32 %v1807_v30, %v1421_v29  ;;  %v1645_v43 = vld [vmem:[#allocation7 + $0x310] sm:$0xf] }
  0x4c   :  { %925 = vmatpush.bf16.msrb.mxu0 %v1318_v40  ;;  %951 = vmatpush.bf16.msrb.mxu2 %v1322_v42  ;;  %v1679_v37 = vld [vmem:[#allocation7 + $0x370] sm:$0xf0]  ;;  %v1426_v40 = vor.u32 %v1803_v34, %v1423_v35  ;;  %v1799_v42 = vld [vmem:[#allocation7 + $0x12c] sm:$0xf0] }
  0x4d   :  { %v1682_v44 = vor.u32 %v1867_v36, %v1679_v37  ;;  %v1863_v45 = vld [vmem:[#allocation7 + $0x32c] sm:$0xf0]  ;;  %v1391_v47 = vld [vmem:[#allocation7 + $0x130] sm:$0xf0]  ;;  %v1493_v36 = vld [vmem:[#allocation7 + $0x1d8] sm:$0xf] }
  0x4e   :  { %938 = vmatpush.bf16.msrb.mxu1 %v1574_v41  ;;  %964 = vmatpush.bf16.msrb.mxu3 %v1578_v46  ;;  %v1389_v41 = vld [vmem:[#allocation7 + $0x110] sm:$0xf]  ;;  %v1795_v46 = vld [vmem:[#allocation7 + $0x114] sm:$0xf]  ;;  %v1646_v51 = vor.u32 %v1863_v45, %v1645_v43  ;;  %v1824_v37 = vld [vmem:[#allocation7 + $0x1f4] sm:$0xf0] }
  0x4f   :  { %v1859_v48 = vld [vmem:[#allocation7 + $0x314] sm:$0xf]  ;;  %v1390_v50 = vor.u32 %v1799_v42, %v1389_v41  ;;  %v1357_v53 = vld [vmem:[#allocation7 + $0xd0] sm:$0xf]  ;;  %v1820_v41 = vld [vmem:[#allocation7 + $0x1dc] sm:$0xf] }
  0x50   :  { %926 = vmatpush.bf16.msrb.mxu0 %v1286_v52  ;;  %952 = vmatpush.bf16.msrb.mxu2 %v1290_v57  ;;  %v1647_v49 = vld [vmem:[#allocation7 + $0x330] sm:$0xf0]  ;;  %v1394_v52 = vor.u32 %v1795_v46, %v1391_v47  ;;  %v1791_v54 = vld [vmem:[#allocation7 + $0xec] sm:$0xf0]  ;;  %v1495_v42 = vld [vmem:[#allocation7 + $0x1f8] sm:$0xf0] }
  0x51   :  { %v1650_v57 = vor.u32 %v1859_v48, %v1647_v49  ;;  %v1855_v58 = vld [vmem:[#allocation7 + $0x2ec] sm:$0xf0]  ;;  %v1787_v59 = vld [vmem:[#allocation7 + $0xd4] sm:$0xf]  ;;  %v1358_v63 = vor.u32 %v1791_v54, %v1357_v53  ;;  %v1884_v45 = vld [vmem:[#allocation7 + $0x3dc] sm:$0xf]  ;;  %v1494_v48 = vor.u32 %v1824_v37, %v1493_v36 }
  0x52   :  { %939 = vmatpush.bf16.msrb.mxu1 %v1542_v56  ;;  %965 = vmatpush.bf16.msrb.mxu3 %v1546_v61  ;;  %v1613_v56 = vld [vmem:[#allocation7 + $0x2d0] sm:$0xf]  ;;  %v1359_v60 = vld [vmem:[#allocation7 + $0xf0] sm:$0xf0]  ;;  %v1751_v46 = vld [vmem:[#allocation7 + $0x3f8] sm:$0xf0] }
  0x53   :  { %v1851_v61 = vld [vmem:[#allocation7 + $0x2d4] sm:$0xf]  ;;  %v1614_v0 = vor.u32 %v1855_v58, %v1613_v56  ;;  %v1362_v1 = vor.u32 %v1787_v59, %v1359_v60  ;;  %v1325_v2 = vld [vmem:[#allocation7 + $0x90] sm:$0xf]  ;;  %v1717_v53 = vld [vmem:[#allocation7 + $0x398] sm:$0xf]  ;;  %v1754_v54 = vor.u32 %v1884_v45, %v1751_v46 }
  0x54   :  { %927 = vmatpush.bf16.msrb.mxu0 %v1254_v5  ;;  %953 = vmatpush.bf16.msrb.mxu2 %v1258_v10  ;;  %v1615_v62 = vld [vmem:[#allocation7 + $0x2f0] sm:$0xf0]  ;;  %v1783_v4 = vld [vmem:[#allocation7 + $0xac] sm:$0xf0]  ;;  %v1880_v56 = vld [vmem:[#allocation7 + $0x3b4] sm:$0xf0] }
  0x55   :  { %v1581_v5 = vld [vmem:[#allocation7 + $0x290] sm:$0xf]  ;;  %v1618_v6 = vor.u32 %v1851_v61, %v1615_v62  ;;  %v1779_v8 = vld [vmem:[#allocation7 + $0x94] sm:$0xf]  ;;  %v1326_v12 = vor.u32 %v1783_v4, %v1325_v2  ;;  %v1463_v58 = vld [vmem:[#allocation7 + $0x1b8] sm:$0xf0]  ;;  %v1718_v62 = vor.u32 %v1880_v56, %v1717_v53 }
  0x56   :  { %940 = vmatpush.bf16.msrb.mxu1 %v1510_v9  ;;  %966 = vmatpush.bf16.msrb.mxu3 %v1514_v13  ;;  %v1847_v7 = vld [vmem:[#allocation7 + $0x2ac] sm:$0xf0]  ;;  %v1327_v9 = vld [vmem:[#allocation7 + $0xb0] sm:$0xf0]  ;;  %v1876_v59 = vld [vmem:[#allocation7 + $0x39c] sm:$0xf] }
  0x57   :  { %928 = vmatmul.bf16.vlgmr.msrb.gmra.mxu0 %v2133_v55  ;;  %954 = vmatmul.bf16.vlgmr.msrb.gmra.mxu2 %v2133_v55  ;;  %v1843_v10 = vld [vmem:[#allocation7 + $0x294] sm:$0xf]  ;;  %v1582_v13 = vor.u32 %v1847_v7, %v1581_v5  ;;  %v1549_v17 = vld [vmem:[#allocation7 + $0x250] sm:$0xf]  ;;  %v1719_v60 = vld [vmem:[#allocation7 + $0x3b8] sm:$0xf0] }
  0x58   :  { %972 = vmatpush.bf16.msra.mxu0 %v1486_v14  ;;  %998 = vmatpush.bf16.msra.mxu2 %v1490_v16  ;;  %v1583_v11 = vld [vmem:[#allocation7 + $0x2b0] sm:$0xf0]  ;;  %v1330_v14 = vor.u32 %v1779_v8, %v1327_v9  ;;  %v1775_v16 = vld [vmem:[#allocation7 + $0x6c] sm:$0xf0]  ;;  %v1685_v2 = vld [vmem:[#allocation7 + $0x358] sm:$0xf]  ;;  %v1722_v4 = vor.u32 %v1876_v59, %v1719_v60 }
  0x59   :  { %941 = vmatmul.bf16.vlgmr.msrb.gmra.mxu1 %v2136_v3  ;;  %967 = vmatmul.bf16.vlgmr.msrb.gmra.mxu3 %v2136_v3  ;;  %v1586_v18 = vor.u32 %v1843_v10, %v1583_v11  ;;  %v1839_v19 = vld [vmem:[#allocation7 + $0x26c] sm:$0xf0]  ;;  %v1295_v21 = vld [vmem:[#allocation7 + $0x70] sm:$0xf0]  ;;  %v1872_v5 = vld [vmem:[#allocation7 + $0x374] sm:$0xf0] }
  0x5a   :  { %985 = vmatpush.bf16.msra.mxu1 %v1742_v15  ;;  %1011 = vmatpush.bf16.msra.mxu3 %v1746_v20  ;;  %v1293_v15 = vld [vmem:[#allocation7 + $0x50] sm:$0xf]  ;;  %v1771_v20 = vld [vmem:[#allocation7 + $0x54] sm:$0xf]  ;;  %v1431_v7 = vld [vmem:[#allocation7 + $0x178] sm:$0xf0]  ;;  %v1686_v11 = vor.u32 %v1872_v5, %v1685_v2 }
  0x5b   :  { %v1835_v22 = vld [vmem:[#allocation7 + $0x254] sm:$0xf]  ;;  %v1294_v24 = vor.u32 %v1775_v16, %v1293_v15  ;;  %v1261_v25 = vld [vmem:[#allocation7 + $0x10] sm:$0xf]  ;;  %v1868_v8 = vld [vmem:[#allocation7 + $0x35c] sm:$0xf] }
  0x5c   :  { %973 = vmatpush.bf16.msra.mxu0 %v1454_v26  ;;  %999 = vmatpush.bf16.msra.mxu2 %v1458_v28  ;;  %v1551_v23 = vld [vmem:[#allocation7 + $0x270] sm:$0xf0]  ;;  %v1767_v26 = vld [vmem:[#allocation7 + $0x2c] sm:$0xf0]  ;;  %v1298_v28 = vor.u32 %v1771_v20, %v1295_v21  ;;  %v1687_v9 = vld [vmem:[#allocation7 + $0x378] sm:$0xf0] }
  0x5d   :  { %v1517_v29 = vld [vmem:[#allocation7 + $0x210] sm:$0xf]  ;;  %v1763_v31 = vld [vmem:[#allocation7 + $0x14] sm:$0xf]  ;;  %v1653_v15 = vld [vmem:[#allocation7 + $0x318] sm:$0xf]  ;;  %v1690_v16 = vor.u32 %v1868_v8, %v1687_v9 }
  0x5e   :  { %986 = vmatpush.bf16.msra.mxu1 %v1710_v27  ;;  %1012 = vmatpush.bf16.msra.mxu3 %v1714_v32  ;;  %v1550_v27 = vor.u32 %v1839_v19, %v1549_v17  ;;  %v1831_v30 = vld [vmem:[#allocation7 + $0x22c] sm:$0xf0]  ;;  %v1554_v32 = vor.u32 %v1835_v22, %v1551_v23  ;;  %v1263_v33 = vld [vmem:[#allocation7 + $0x30] sm:$0xf0]  ;;  %v1864_v17 = vld [vmem:[#allocation7 + $0x334] sm:$0xf0] }
  0x5f   :  { %v1827_v34 = vld [vmem:[#allocation7 + $0x214] sm:$0xf]  ;;  %v1518_v43 = vor.u32 %v1831_v30, %v1517_v29  ;;  %v1399_v19 = vld [vmem:[#allocation7 + $0x138] sm:$0xf0]  ;;  %v1654_v23 = vor.u32 %v1864_v17, %v1653_v15  ;;  %v1856_v29 = vld [vmem:[#allocation7 + $0x2f4] sm:$0xf0] }
  0x60   :  { %974 = vmatpush.bf16.msra.mxu0 %v1422_v38  ;;  %1000 = vmatpush.bf16.msra.mxu2 %v1426_v40  ;;  %v1519_v35 = vld [vmem:[#allocation7 + $0x230] sm:$0xf0]  ;;  %v1749_v38 = vld [vmem:[#allocation7 + $0x3d8] sm:$0xf]  ;;  %v1860_v20 = vld [vmem:[#allocation7 + $0x31c] sm:$0xf] }
  0x61   :  { %v1888_v40 = vld [vmem:[#allocation7 + $0x3f4] sm:$0xf0]  ;;  %v1522_v47 = vor.u32 %v1827_v34, %v1519_v35  ;;  %v1655_v21 = vld [vmem:[#allocation7 + $0x338] sm:$0xf0] }
  0x62   :  { %987 = vmatpush.bf16.msra.mxu1 %v1678_v39  ;;  %1013 = vmatpush.bf16.msra.mxu3 %v1682_v44  ;;  %v1262_v39 = vor.u32 %v1767_v26, %v1261_v25  ;;  %v1266_v44 = vor.u32 %v1763_v31, %v1263_v33  ;;  %v1750_v49 = vor.u32 %v1888_v40, %v1749_v38  ;;  %v1365_v25 = vld [vmem:[#allocation7 + $0xd8] sm:$0xf]  ;;  %v1788_v30 = vld [vmem:[#allocation7 + $0xdc] sm:$0xf] }
  0x63   :  { %v1792_v26 = vld [vmem:[#allocation7 + $0xf4] sm:$0xf0]  ;;  %v1367_v31 = vld [vmem:[#allocation7 + $0xf8] sm:$0xf0] }
  0x64   :  { %975 = vmatpush.bf16.msra.mxu0 %v1390_v50  ;;  %1001 = vmatpush.bf16.msra.mxu2 %v1394_v52  ;;  %v1498_v50 = vor.u32 %v1820_v41, %v1495_v42  ;;  %v1816_v52 = vld [vmem:[#allocation7 + $0x1b4] sm:$0xf0]  ;;  %v1623_v33 = vld [vmem:[#allocation7 + $0x2f8] sm:$0xf0]  ;;  %v1366_v34 = vor.u32 %v1792_v26, %v1365_v25  ;;  %v1370_v36 = vor.u32 %v1788_v30, %v1367_v31 }
  0x65   :  { %v1333_v37 = vld [vmem:[#allocation7 + $0x98] sm:$0xf]  ;;  %v1780_v42 = vld [vmem:[#allocation7 + $0x9c] sm:$0xf] }
  0x66   :  { %988 = vmatpush.bf16.msra.mxu1 %v1646_v51  ;;  %1014 = vmatpush.bf16.msra.mxu3 %v1650_v57  ;;  %v1461_v51 = vld [vmem:[#allocation7 + $0x198] sm:$0xf]  ;;  %v1812_v57 = vld [vmem:[#allocation7 + $0x19c] sm:$0xf] }
  0x67   :  { %v1462_v61 = vor.u32 %v1816_v52, %v1461_v51  ;;  %v1784_v38 = vld [vmem:[#allocation7 + $0xb4] sm:$0xf0]  ;;  %v1591_v45 = vld [vmem:[#allocation7 + $0x2b8] sm:$0xf0] }
  0x68   :  { %976 = vmatpush.bf16.msra.mxu0 %v1358_v63  ;;  %1002 = vmatpush.bf16.msra.mxu2 %v1362_v1  ;;  %v1466_v63 = vor.u32 %v1812_v57, %v1463_v58  ;;  %v1808_v1 = vld [vmem:[#allocation7 + $0x174] sm:$0xf0]  ;;  %v1334_v46 = vor.u32 %v1784_v38, %v1333_v37  ;;  %v1303_v56 = vld [vmem:[#allocation7 + $0x78] sm:$0xf0] }
  0x69   :  { %v1848_v41 = vld [vmem:[#allocation7 + $0x2b4] sm:$0xf0]  ;;  %v1836_v57 = vld [vmem:[#allocation7 + $0x25c] sm:$0xf] }
  0x6a   :  { %989 = vmatpush.bf16.msra.mxu1 %v1614_v0  ;;  %1015 = vmatpush.bf16.msra.mxu3 %v1618_v6  ;;  %v1429_v0 = vld [vmem:[#allocation7 + $0x158] sm:$0xf]  ;;  %v1804_v6 = vld [vmem:[#allocation7 + $0x15c] sm:$0xf] }
  0x6b   :  { %v1430_v10 = vor.u32 %v1808_v1, %v1429_v0  ;;  %v1557_v51 = vld [vmem:[#allocation7 + $0x258] sm:$0xf]  ;;  %v1559_v58 = vld [vmem:[#allocation7 + $0x278] sm:$0xf0] }
  0x6c   :  { %977 = vmatpush.bf16.msra.mxu0 %v1326_v12  ;;  %1003 = vmatpush.bf16.msra.mxu2 %v1330_v14  ;;  %v1434_v12 = vor.u32 %v1804_v6, %v1431_v7  ;;  %v1800_v14 = vld [vmem:[#allocation7 + $0x134] sm:$0xf0]  ;;  %v1562_v1 = vor.u32 %v1836_v57, %v1559_v58  ;;  %v1271_v5 = vld [vmem:[#allocation7 + $0x38] sm:$0xf0] }
  0x6d   :  { %v1840_v53 = vld [vmem:[#allocation7 + $0x274] sm:$0xf0]  ;;  %v1828_v6 = vld [vmem:[#allocation7 + $0x21c] sm:$0xf] }
  0x6e   :  { %990 = vmatpush.bf16.msra.mxu1 %v1582_v13  ;;  %1016 = vmatpush.bf16.msra.mxu3 %v1586_v18  ;;  %v1397_v13 = vld [vmem:[#allocation7 + $0x118] sm:$0xf]  ;;  %v1796_v18 = vld [vmem:[#allocation7 + $0x11c] sm:$0xf]  ;;  %v1558_v60 = vor.u32 %v1840_v53, %v1557_v51 }
  0x6f   :  { %v1398_v22 = vor.u32 %v1800_v14, %v1397_v13  ;;  %v1525_v0 = vld [vmem:[#allocation7 + $0x218] sm:$0xf]  ;;  %v1527_v7 = vld [vmem:[#allocation7 + $0x238] sm:$0xf0] }
  0x70   :  { %978 = vmatpush.bf16.msra.mxu0 %v1294_v24  ;;  %1004 = vmatpush.bf16.msra.mxu2 %v1298_v28  ;;  %v1402_v24 = vor.u32 %v1796_v18, %v1399_v19  ;;  %v1658_v28 = vor.u32 %v1860_v20, %v1655_v21  ;;  %v1832_v2 = vld [vmem:[#allocation7 + $0x234] sm:$0xf0] }
  0x71   :  { %v1526_v9 = vor.u32 %v1832_v2, %v1525_v0 }
  0x72   :  { %991 = vmatpush.bf16.msra.mxu1 %v1550_v27  ;;  %1017 = vmatpush.bf16.msra.mxu3 %v1554_v32  ;;  %v1621_v27 = vld [vmem:[#allocation7 + $0x2d8] sm:$0xf]  ;;  %v1852_v32 = vld [vmem:[#allocation7 + $0x2dc] sm:$0xf] }
  0x73   :  { %v1622_v35 = vor.u32 %v1856_v29, %v1621_v27  ;;  %v1626_v40 = vor.u32 %v1852_v32, %v1623_v33 }
  0x74   :  { %979 = vmatpush.bf16.msra.mxu0 %v1262_v39  ;;  %1005 = vmatpush.bf16.msra.mxu2 %v1266_v44  ;;  %v1589_v39 = vld [vmem:[#allocation7 + $0x298] sm:$0xf]  ;;  %v1844_v44 = vld [vmem:[#allocation7 + $0x29c] sm:$0xf] }
  0x75   :  { %v1594_v52 = vor.u32 %v1844_v44, %v1591_v45 }
  0x76   :  { %992 = vmatpush.bf16.msra.mxu1 %v1518_v43  ;;  %1018 = vmatpush.bf16.msra.mxu3 %v1522_v47  ;;  %v1335_v43 = vld [vmem:[#allocation7 + $0xb8] sm:$0xf0]  ;;  %v1590_v47 = vor.u32 %v1848_v41, %v1589_v39 }
  0x77   :  { %980 = vmatmul.bf16.vlgmr.msra.gmra.mxu0 %v2133_v55  ;;  %1006 = vmatmul.bf16.vlgmr.msra.gmra.mxu2 %v2133_v55 }
  0x78   :  { %1024 = vmatpush.bf16.msrb.mxu0 %v1494_v48  ;;  %1050 = vmatpush.bf16.msrb.mxu2 %v1498_v50  ;;  %v1338_v48 = vor.u32 %v1780_v42, %v1335_v43  ;;  %v1776_v50 = vld [vmem:[#allocation7 + $0x74] sm:$0xf0] }
  0x79   :  { %993 = vmatmul.bf16.vlgmr.msra.gmra.mxu1 %v2136_v3  ;;  %1019 = vmatmul.bf16.vlgmr.msra.gmra.mxu3 %v2136_v3 }
  0x7a   :  { %1037 = vmatpush.bf16.msrb.mxu1 %v1750_v49  ;;  %1063 = vmatpush.bf16.msrb.mxu3 %v1754_v54  ;;  %v1301_v49 = vld [vmem:[#allocation7 + $0x58] sm:$0xf]  ;;  %v1772_v54 = vld [vmem:[#allocation7 + $0x5c] sm:$0xf] }
  0x7b   :  { %v1302_v59 = vor.u32 %v1776_v50, %v1301_v49 }
  0x7c   :  { %1025 = vmatpush.bf16.msrb.mxu0 %v1462_v61  ;;  %1051 = vmatpush.bf16.msrb.mxu2 %v1466_v63  ;;  %v1306_v61 = vor.u32 %v1772_v54, %v1303_v56  ;;  %v1768_v63 = vld [vmem:[#allocation7 + $0x34] sm:$0xf0] }
  0x7e   :  { %1038 = vmatpush.bf16.msrb.mxu1 %v1718_v62  ;;  %1064 = vmatpush.bf16.msrb.mxu3 %v1722_v4  ;;  %v1269_v62 = vld [vmem:[#allocation7 + $0x18] sm:$0xf]  ;;  %v1764_v4 = vld [vmem:[#allocation7 + $0x1c] sm:$0xf] }
  0x7f   :  { %v1270_v8 = vor.u32 %v1768_v63, %v1269_v62 }
  0x80   :  { %1026 = vmatpush.bf16.msrb.mxu0 %v1430_v10  ;;  %1052 = vmatpush.bf16.msrb.mxu2 %v1434_v12  ;;  %v1274_v10 = vor.u32 %v1764_v4, %v1271_v5 }
  0x82   :  { %1039 = vmatpush.bf16.msrb.mxu1 %v1686_v11  ;;  %1065 = vmatpush.bf16.msrb.mxu3 %v1690_v16  ;;  %v1530_v11 = vor.u32 %v1828_v6, %v1527_v7  ;;  %v2153_v16 = vld [vmem:[#allocation8] sm:$0xff] }
  0x83   :  { %v212_v19 = vperm.slane %v2153_v16, 0  ;;  %v215_v32 = vperm.slane %v2153_v16, 3 }
  0x84   :  { %1027 = vmatpush.bf16.msrb.mxu0 %v1398_v22  ;;  %1053 = vmatpush.bf16.msrb.mxu2 %v1402_v24 }
  0x86   :  { %1040 = vmatpush.bf16.msrb.mxu1 %v1654_v23  ;;  %1066 = vmatpush.bf16.msrb.mxu3 %v1658_v28  ;;  %v213_v23 = vperm.slane %v2153_v16, 1 }
  0x88   :  { %1028 = vmatpush.bf16.msrb.mxu0 %v1366_v34  ;;  %1054 = vmatpush.bf16.msrb.mxu2 %v1370_v36 }
  0x8a   :  { %1041 = vmatpush.bf16.msrb.mxu1 %v1622_v35  ;;  %1067 = vmatpush.bf16.msrb.mxu3 %v1626_v40 }
  0x8c   :  { %1029 = vmatpush.bf16.msrb.mxu0 %v1334_v46  ;;  %1055 = vmatpush.bf16.msrb.mxu2 %v1338_v48 }
  0x8e   :  { %1042 = vmatpush.bf16.msrb.mxu1 %v1590_v47  ;;  %1068 = vmatpush.bf16.msrb.mxu3 %v1594_v52 }
  0x90   :  { %1030 = vmatpush.bf16.msrb.mxu0 %v1302_v59  ;;  %1056 = vmatpush.bf16.msrb.mxu2 %v1306_v61 }
  0x92   :  { %1043 = vmatpush.bf16.msrb.mxu1 %v1558_v60  ;;  %1069 = vmatpush.bf16.msrb.mxu3 %v1562_v1  ;;  %v216_v60 = vperm.slane %v2153_v16, 4 }
  0x94   :  { %1031 = vmatpush.bf16.msrb.mxu0 %v1270_v8  ;;  %1057 = vmatpush.bf16.msrb.mxu2 %v1274_v10 }
  0x96   :  { %1044 = vmatpush.bf16.msrb.mxu1 %v1526_v9  ;;  %1070 = vmatpush.bf16.msrb.mxu3 %v1530_v11 }
  0x97   :  { %1032 = vmatmul.bf16.vlgmr.msrb.gmra.mxu0 %v2133_v55  ;;  %1058 = vmatmul.bf16.vlgmr.msrb.gmra.mxu2 %v2133_v55 }
  0x99   :  { %1045 = vmatmul.bf16.vlgmr.msrb.gmra.mxu1 %v2136_v3  ;;  %1071 = vmatmul.bf16.vlgmr.msrb.gmra.mxu3 %v2136_v3  ;;  %v214_v3 = vperm.slane %v2153_v16, 2 }
  0xb4   :  { %v877_v12 = vpop.f32.mrf.mxu0 }
  0xb5   :  { %v878_v21 = vadd.f32 %v877_v12, %v212_v19  ;;  %v217_v19 = vperm.slane %v2153_v16, 5 }
  0xb6   :  { %v890_v13 = vpop.f32.mrf.mxu1 }
  0xb7   :  { %v891_v24 = vadd.f32 %v890_v13, %v878_v21 }
  0xb9   :  { %v1755_v55 = vmul.f32 -1.442695, %v891_v24  ;;  %v1192_v24 = vld [vmem:[#allocation5] sm:$0xff] }
  0xba   :  { %v903_v14 = vpop.f32.mrf.mxu2 }
  0xbb   :  { %v904_v25 = vadd.f32 %v903_v14, %v213_v23  ;;  %1897 = vpow2.f32 %v1755_v55 }
  0xbc   :  { %v879_v15 = vpop.f32.mrf.mxu0  ;;  %v916_v17 = vpop.f32.mrf.mxu3 }
  0xbd   :  { %v917_v26 = vadd.f32 %v916_v17, %v904_v25 }
  0xbe   :  { %v892_v18 = vpop.f32.mrf.mxu1 }
  0xbf   :  { %v1756_v30 = vmul.f32 -1.442695, %v917_v26 }
  0xc1   :  { %v1898_v33 = vpop.eup %1897  ;;  %1899 = vpow2.f32 %v1756_v30 }
  0xc2   :  { %v905_v20 = vpop.f32.mrf.mxu2  ;;  %v2159_v36 = vadd.f32 1.0, %v1898_v33 }
  0xc4   :  { %v918_v22 = vpop.f32.mrf.mxu3  ;;  %v1095_v9 = vand.u32 2147483648, %v2159_v36  ;;  %vm1089_vm3 = vweird.f32 %v2159_v36  ;;  %v1093_v11 = vand.u32 2147483647, %v2159_v36 }
  0xc6   :  { %v1096_v22 = vor.u32 1.1754944e-38, %v1095_v9  ;;  %vm1094_vm10 = vcmp.eq.f32.partialorder %v1093_v11, 8.507059e+37 }
  0xc7   :  { %v1900_v42 = vpop.eup %1899 }
  0xc8   :  { %v2162_v47 = vadd.f32 1.0, %v1900_v42 }
  0xca   :  { %vm1104_vm11 = vweird.f32 %v2162_v47 }
  0xd4   :  { %v929_v27 = vpop.f32.mrf.mxu0 }
  0xd5   :  { %v930_v28 = vadd.f32 %v929_v27, %v214_v3 }
  0xd6   :  { %v942_v29 = vpop.f32.mrf.mxu1 }
  0xd7   :  { %v943_v31 = vadd.f32 %v942_v29, %v930_v28 }
  0xd9   :  { %v1757_v34 = vmul.f32 -1.442695, %v943_v31 }
  0xda   :  { %v955_v35 = vpop.f32.mrf.mxu2 }
  0xdb   :  { %1901 = vpow2.f32 %v1757_v34  ;;  %v956_v37 = vadd.f32 %v955_v35, %v215_v32  ;;  %v1108_v32 = vand.u32 2147483647, %v2162_v47 }
  0xdc   :  { %v968_v38 = vpop.f32.mrf.mxu3  ;;  %v931_v39 = vpop.f32.mrf.mxu0  ;;  %1903 = vrcp.f32 %v2159_v36 }
  0xdd   :  { %v969_v41 = vadd.f32 %v968_v38, %v956_v37  ;;  %v1110_v37 = vand.u32 2147483648, %v2162_v47  ;;  %vm1109_vm15 = vcmp.eq.f32.partialorder %v1108_v32, 8.507059e+37 }
  0xde   :  { %v944_v40 = vpop.f32.mrf.mxu1 }
  0xdf   :  { %v1758_v43 = vmul.f32 -1.442695, %v969_v41 }
  0xe1   :  { %v1902_v44 = vpop.eup %1901  ;;  %1905 = vpow2.f32 %v1758_v43 }
  0xe2   :  { %v1120_v45 = vadd.f32 1.0, %v1902_v44  ;;  %v957_v46 = vpop.f32.mrf.mxu2  ;;  %v2164_v49 = vpop.eup %1903  ;;  %v1111_v44 = vor.u32 1.1754944e-38, %v1110_v37 }
  0xe3   :  { %v1085_v51 = vmul.f32 %v2164_v49, %v2159_v36  ;;  %vm1090_vm4 = vweird.f32 %v2164_v49  ;;  %v1193_v46 = vld [vmem:[#allocation5 + $0x8] sm:$0xff] }
  0xe4   :  { %1907 = vrcp.f32 %v1120_v45  ;;  %v970_v48 = vpop.f32.mrf.mxu3  ;;  %vm1127_vm0 = vweird.f32 %v1120_v45  ;;  %v1133_v63 = vand.u32 2147483648, %v1120_v45  ;;  %v1131_v5 = vand.u32 2147483647, %v1120_v45  ;;  %vm2192_vm8 = vmor %vm1089_vm3, %vm1090_vm4 }
  0xe5   :  { %1909 = vrcp.f32 %v2162_v47  ;;  %v1086_v56 = vsub.f32 1.0, %v1085_v51 }
  0xe6   :  { %v1134_v13 = vor.u32 1.1754944e-38, %v1133_v63  ;;  %vm1132_vm5 = vcmp.eq.f32.partialorder %v1131_v5, 8.507059e+37 }
  0xe7   :  { %v1906_v50 = vpop.eup %1905  ;;  %v1087_v0 = vmul.f32 %v2164_v49, %v1086_v56  ;;  %v218_v56 = vperm.slane %v2153_v16, 6 }
  0xe8   :  { %v2169_v52 = vadd.f32 1.0, %v1906_v50 }
  0xe9   :  { %v1088_v15 = vadd.f32 %v2164_v49, %v1087_v0 }
  0xea   :  { %v1908_v53 = vpop.eup %1907  ;;  %1911 = vrcp.f32 %v2169_v52  ;;  %vm1142_vm6 = vweird.f32 %v2169_v52  ;;  %v1148_v21 = vand.u32 2147483648, %v2169_v52  ;;  %v1146_v26 = vand.u32 2147483647, %v2169_v52 }
  0xeb   :  { %v1123_v54 = vmul.f32 %v1908_v53, %v1120_v45  ;;  %v2172_v58 = vpop.eup %1909  ;;  %vm1128_vm1 = vweird.f32 %v1908_v53  ;;  %v1092_v28 = vsel %vm2192_vm8, %v2164_v49, %v1088_v15 }
  0xec   :  { %v1100_v62 = vmul.f32 %v2172_v58, %v2162_v47  ;;  %vm2179_vm2 = vmor %vm1127_vm0, %vm1128_vm1  ;;  %vm1105_vm12 = vweird.f32 %v2172_v58  ;;  %v1149_v34 = vor.u32 1.1754944e-38, %v1148_v21  ;;  %v1097_v39 = vsel %vm1094_vm10, %v1096_v22, %v1092_v28 }
  0xed   :  { %v1124_v57 = vsub.f32 1.0, %v1123_v54  ;;  %vm1147_vm13 = vcmp.eq.f32.partialorder %v1146_v26, 8.507059e+37  ;;  %vm1106_vm14 = vmor %vm1104_vm11, %vm1105_vm12 }
  0xee   :  { %v1101_v12 = vsub.f32 1.0, %v1100_v62 }
  0xef   :  { %v1125_v59 = vmul.f32 %v1908_v53, %v1124_v57 }
  0xf0   :  { %v1912_v61 = vpop.eup %1911  ;;  %v1102_v55 = vmul.f32 %v2172_v58, %v1101_v12 }
  0xf1   :  { %v1138_v1 = vmul.f32 %v1912_v61, %v2169_v52  ;;  %v1126_v4 = vadd.f32 %v1908_v53, %v1125_v59  ;;  %vm1143_vm7 = vweird.f32 %v1912_v61 }
  0xf2   :  { %vm2199_vm9 = vmor %vm1142_vm6, %vm1143_vm7  ;;  %v1103_v40 = vadd.f32 %v2172_v58, %v1102_v55 }
  0xf3   :  { %v1139_v10 = vsub.f32 1.0, %v1138_v1  ;;  %v1130_v18 = vsel %vm2179_vm2, %v1908_v53, %v1126_v4 }
  0xf4   :  { %v981_v2 = vpop.f32.mrf.mxu0  ;;  %v1135_v23 = vsel %vm1132_vm5, %v1134_v13, %v1130_v18  ;;  %v1107_v48 = vsel %vm1106_vm14, %v2172_v58, %v1103_v40 }
  0xf5   :  { %v982_v7 = vadd.f32 %v981_v2, %v216_v60  ;;  %v1140_v17 = vmul.f32 %v1912_v61, %v1139_v10  ;;  %v1194_v35 = vmul.f32 %v1192_v24, %v1135_v23  ;;  %v1112_v52 = vsel %vm1109_vm15, %v1111_v44, %v1107_v48 }
  0xf6   :  { %v994_v8 = vpop.f32.mrf.mxu1 }
  0xf7   :  { %v995_v14 = vadd.f32 %v994_v8, %v982_v7  ;;  %v1141_v3 = vadd.f32 %v1912_v61, %v1140_v17 }
  0xf9   :  { %1913 = vtanh.f32 %v995_v14  ;;  %v1145_v41 = vsel %vm2199_vm9, %v1912_v61, %v1141_v3  ;;  %v219_v61 = vperm.slane %v2153_v16, 7 }
  0xfa   :  { %v1007_v25 = vpop.f32.mrf.mxu2  ;;  %v1150_v45 = vsel %vm1147_vm13, %v1149_v34, %v1145_v41 }
  0xfb   :  { %v1008_v29 = vadd.f32 %v1007_v25, %v217_v19  ;;  %v1195_v50 = vmul.f32 %v1193_v46, %v1150_v45 }
  0xfc   :  { %v1020_v30 = vpop.f32.mrf.mxu3  ;;  %v983_v31 = vpop.f32.mrf.mxu0 }
  0xfd   :  { %v1021_v36 = vadd.f32 %v1020_v30, %v1008_v29 }
  0xfe   :  { %v996_v33 = vpop.f32.mrf.mxu1 }
  0xff   :  { %v1914_v38 = vpop.eup %1913  ;;  %1915 = vtanh.f32 %v1021_v36 }
 0x100   :  { %v1196_v42 = vmul.f32 %v1914_v38, %v1097_v39 }
 0x102   :  { %v1198_v43 = vadd.f32 %v1196_v42, %v1194_v35  ;;  %v1009_v49 = vpop.f32.mrf.mxu2 }
 0x104   :  { %1206 = vst [vmem:[#allocation11] sm:$0xff] %v1198_v43  ;;  %v1022_v47 = vpop.f32.mrf.mxu3 }
 0x105   :  { %v1916_v51 = vpop.eup %1915 }
 0x106   :  { %v1197_v53 = vmul.f32 %v1916_v51, %v1112_v52 }
 0x108   :  { %v1199_v54 = vadd.f32 %v1197_v53, %v1195_v50 }
 0x10a   :  { %1207 = vst [vmem:[#allocation11 + $0x8] sm:$0xff] %v1199_v54 }
 0x10b   :  { %1229 = dma.vmem_to_hbm [thread:$0]  %s1225_s3, 256, %s1227_s15, [#allocation12]  }
 0x114   :  { %v1033_v57 = vpop.f32.mrf.mxu0 }
 0x115   :  { %v1034_v58 = vadd.f32 %v1033_v57, %v218_v56 }
 0x116   :  { %v1046_v59 = vpop.f32.mrf.mxu1 }
 0x117   :  { %v1047_v60 = vadd.f32 %v1046_v59, %v1034_v58 }
 0x119   :  { %v1759_v62 = vmul.f32 -1.442695, %v1047_v60 }
 0x11a   :  { %v1059_v63 = vpop.f32.mrf.mxu2 }
 0x11b   :  { %1917 = vpow2.f32 %v1759_v62  ;;  %v1060_v0 = vadd.f32 %v1059_v63, %v219_v61 }
 0x11c   :  { %v1072_v1 = vpop.f32.mrf.mxu3  ;;  %v1035_v2 = vpop.f32.mrf.mxu0 }
 0x11d   :  { %v1073_v5 = vadd.f32 %v1072_v1, %v1060_v0 }
 0x11e   :  { %v1048_v4 = vpop.f32.mrf.mxu1 }
 0x11f   :  { %v1760_v6 = vmul.f32 -1.442695, %v1073_v5 }
 0x121   :  { %v1918_v7 = vpop.eup %1917  ;;  %1919 = vpow2.f32 %v1760_v6 }
 0x122   :  { %v1160_v8 = vadd.f32 1.0, %v1918_v7  ;;  %v1061_v9 = vpop.f32.mrf.mxu2 }
 0x124   :  { %1921 = vrcp.f32 %v1160_v8  ;;  %v1074_v10 = vpop.f32.mrf.mxu3  ;;  %v1173_v15 = vand.u32 2147483648, %v1160_v8  ;;  %vm1167_vm0 = vweird.f32 %v1160_v8  ;;  %v1171_v18 = vand.u32 2147483647, %v1160_v8 }
 0x126   :  { %v1174_v22 = vor.u32 1.1754944e-38, %v1173_v15  ;;  %vm1172_vm3 = vcmp.eq.f32.partialorder %v1171_v18, 8.507059e+37 }
 0x127   :  { %v1920_v11 = vpop.eup %1919 }
 0x128   :  { %v1161_v12 = vadd.f32 1.0, %v1920_v11 }
 0x12a   :  { %v1922_v13 = vpop.eup %1921  ;;  %1923 = vrcp.f32 %v1161_v12  ;;  %v1188_v3 = vand.u32 2147483648, %v1161_v12  ;;  %v1186_v28 = vand.u32 2147483647, %v1161_v12  ;;  %vm1182_vm5 = vweird.f32 %v1161_v12 }
 0x12b   :  { %v1163_v14 = vmul.f32 %v1922_v13, %v1160_v8  ;;  %1925 = vtanh.f32 %v1198_v43  ;;  %vm1168_vm1 = vweird.f32 %v1922_v13 }
 0x12c   :  { %vm1169_vm2 = vmor %vm1167_vm0, %vm1168_vm1  ;;  %1927 = vtanh.f32 %v1199_v54  ;;  %v1189_v30 = vor.u32 1.1754944e-38, %v1188_v3  ;;  %vm1187_vm7 = vcmp.eq.f32.partialorder %v1186_v28, 8.507059e+37 }
 0x12d   :  { %v1164_v16 = vsub.f32 1.0, %v1163_v14 }
 0x12f   :  { %v1165_v17 = vmul.f32 %v1922_v13, %v1164_v16 }
 0x130   :  { %v1924_v19 = vpop.eup %1923 }
 0x131   :  { %v1166_v20 = vadd.f32 %v1922_v13, %v1165_v17  ;;  %v1178_v21 = vmul.f32 %v1924_v19, %v1161_v12  ;;  %v1926_v24 = vpop.eup %1925  ;;  %vm1183_vm4 = vweird.f32 %v1924_v19 }
 0x132   :  { %vm1184_vm6 = vmor %vm1182_vm5, %vm1183_vm4  ;;  %v1928_v32 = vpop.eup %1927 }
 0x133   :  { %v1170_v23 = vsel %vm1169_vm2, %v1922_v13, %v1166_v20  ;;  %v1179_v25 = vsub.f32 1.0, %v1178_v21 }
 0x134   :  { %v1175_v55 = vsel %vm1172_vm3, %v1174_v22, %v1170_v23 }
 0x135   :  { %v1202_v26 = vmul.f32 %v1926_v24, %v1175_v55  ;;  %v1180_v27 = vmul.f32 %v1924_v19, %v1179_v25 }
 0x137   :  { %1204 = vst [vmem:[#allocation10] sm:$0xff] %v1202_v26  ;;  %v1181_v29 = vadd.f32 %v1924_v19, %v1180_v27 }
 0x139   :  { %v1185_v31 = vsel %vm1184_vm6, %v1924_v19, %v1181_v29 }
 0x13a   :  { %v1190_v33 = vsel %vm1187_vm7, %v1189_v30, %v1185_v31 }
 0x13b   :  { %v1203_v34 = vmul.f32 %v1928_v32, %v1190_v33 }
 0x13d   :  { %1205 = vst [vmem:[#allocation10 + $0x8] sm:$0xff] %v1203_v34 }
 0x13e   :  { %1218 = dma.vmem_to_hbm [thread:$0]  %s1214_s16, 256, %s1216_s19, [#allocation4]  }
 0x13f   :  { %2079 = dma.done.wait [#allocation4], 256  }
 0x140   :  { %2080 = vsyncadd [#allocation4], 4294967040 }
 0x141   :  { %2081 = dma.done.wait [#allocation12], 256  }
 0x142   :  { %2082 = vsyncadd [#allocation12], 4294967040 }
 0x143   :  { %1238 = vsyncpa [#allocation3], 1 }
 0x144   :  { %1239 = vsyncpa [#allocation6], 1 }
 0x145   :  { %1240 = vsyncpa [#allocation9], 1 }
 0x146   :  { %1241 = vsyncpa [#allocation4], 1 }
 0x147   :  { %1242 = vsyncpa [#allocation12], 1 }

</bundles_post_ra>
